<compile_context>
chip_gen: v7x
topology: tpu7x:2x2x1
jax: 0.10.0
libtpu: 0.0.40
codegen_flags: <defaults>
</compile_context>

<pallas_src>
import math
import jax
import jax.numpy as jnp
from jax.experimental import pallas as pl
from jax.experimental.pallas import tpu as pltpu

# ----------------------- synthetic small T5 config -----------------------
VOCAB_SIZE = 16          # tokenizer.vocab_size
HIDDEN_DIM = 24          # rep_linear input dim
D_MODEL = 32             # config.d_model
NUM_HEADS = 4
D_KV = 8
INNER_DIM = NUM_HEADS * D_KV
D_FF = 64
NUM_LAYERS = 2
NUM_BUCKETS = 8
MAX_DISTANCE = 16
PAD_TOKEN_ID = 0
DECODER_START_TOKEN_ID = 0
LN_EPS = 1e-6
NEG_INF = -1e9


# --------------------------- fused Pallas kernel ---------------------------
def _build_fused_kernel(B, L):
    BL = B * L
    f32 = jnp.float32

    def kernel(dec_ids_ref, labels_ref, cond_ref, shared_ref, rep_w_ref, rep_b_ref,
               bias_ref, ln_sa_ref, sa_q_ref, sa_k_ref, sa_v_ref, sa_o_ref,
               ca_v_ref, ca_o_ref, ln_ff_ref, wi_ref, wo_ref, final_ln_ref,
               loss_ref):

        def rmsnorm(x, w):                                   # T5LayerNorm (RMS, f32)
            var = jnp.mean(x * x, axis=-1, keepdims=True)
            return x * jax.lax.rsqrt(var + LN_EPS) * w

        # ---------- token embedding via one-hot matmul (gather-free) ----------
        dec_ids = dec_ids_ref[...]                                   # (BL, 1) int32
        vcol = jax.lax.broadcasted_iota(jnp.int32, (BL, VOCAB_SIZE), 1)
        dec_onehot = (vcol == dec_ids).astype(f32)                   # (BL, V)
        shared = shared_ref[...]                                     # (V, D)
        hidden = jnp.dot(dec_onehot, shared, preferred_element_type=f32)   # (BL, D)

        # ---------- encoder rep: rep_linear(condition), B rows only ----------
        enc = (jnp.dot(cond_ref[...], rep_w_ref[...], preferred_element_type=f32)
               + rep_b_ref[...])                                     # (B, D)

        for l in range(NUM_LAYERS):
            # ------------------- self attention -------------------
            normed = rmsnorm(hidden, ln_sa_ref[l])
            q = jnp.dot(normed, sa_q_ref[l], preferred_element_type=f32)   # (BL, INNER)
            k = jnp.dot(normed, sa_k_ref[l], preferred_element_type=f32)
            v = jnp.dot(normed, sa_v_ref[l], preferred_element_type=f32)
            q3 = q.reshape(B, L, INNER_DIM)
            k3 = k.reshape(B, L, INNER_DIM)
            v3 = v.reshape(B, L, INNER_DIM)

            ctx_heads = []
            for h in range(NUM_HEADS):
                sl = slice(h * D_KV, (h + 1) * D_KV)
                qh = q3[:, :, sl]                                    # (B, L, dkv)
                kh = k3[:, :, sl]
                vh = v3[:, :, sl]
                # T5: no 1/sqrt(d) scaling of the scores
                s = jnp.einsum('bid,bjd->bij', qh, kh,
                               preferred_element_type=f32)           # (B, L, L)
                s = s + bias_ref[h][None, :, :]                      # rel-pos + causal
                m = jnp.max(s, axis=-1, keepdims=True)
                p = jnp.exp(s - m)
                inv = pl.reciprocal(jnp.sum(p, axis=-1, keepdims=True), approx=True)
                ctx_heads.append(jnp.einsum('bij,bjd->bid', p * inv, vh,
                                            preferred_element_type=f32))  # (B, L, dkv)
            ctx = jnp.concatenate(ctx_heads, axis=-1)                # (B, L, INNER)
            attn_out = jnp.dot(ctx.reshape(BL, INNER_DIM), sa_o_ref[l],
                               preferred_element_type=f32)           # (BL, D)
            hidden = hidden + attn_out

            # ------------- cross attention over the length-1 encoder output -------------
            # softmax over a single key == 1  =>  output == wo(wv(enc))  (exact).
            cross_v = jnp.dot(enc, ca_v_ref[l], preferred_element_type=f32)   # (B, INNER)
            cross = jnp.dot(cross_v, ca_o_ref[l], preferred_element_type=f32) # (B, D)
            hidden = (hidden.reshape(B, L, D_MODEL)
                      + cross[:, None, :]).reshape(BL, D_MODEL)

            # ------------------- feed forward (DenseReluDense) -------------------
            normed = rmsnorm(hidden, ln_ff_ref[l])
            hmid = jnp.maximum(jnp.dot(normed, wi_ref[l], preferred_element_type=f32), 0.0)
            hidden = hidden + jnp.dot(hmid, wo_ref[l], preferred_element_type=f32)

        # ---------- final norm, tied LM head, cross entropy ----------
        hidden = rmsnorm(hidden, final_ln_ref[...]) * (D_MODEL ** -0.5)
        logits = jax.lax.dot_general(hidden, shared, (((1,), (1,)), ((), ())),
                                     preferred_element_type=f32)     # (BL, V)

        labels = labels_ref[...]                                     # (BL, 1) int32
        m = jnp.max(logits, axis=-1, keepdims=True)
        lse = jnp.log(jnp.sum(jnp.exp(logits - m), axis=-1, keepdims=True)) + m
        onehot = (vcol == labels).astype(f32)
        tgt = jnp.sum(logits * onehot, axis=-1, keepdims=True)       # (BL, 1)
        valid = (labels != -100).astype(f32)                         # (BL, 1)
        loss_sum = jnp.sum((lse - tgt) * valid, axis=(0, 1), keepdims=True)   # (1, 1)
        count = jnp.sum(valid, axis=(0, 1), keepdims=True)                     # (1, 1)
        loss_ref[...] = loss_sum / count

    return kernel


def _full_spec(shape):
    nd = len(shape)
    return pl.BlockSpec(tuple(shape), lambda i, nd=nd: (0,) * nd)


# ------------------------------ JAX glue ----------------------------------
def _relative_position_bucket(relative_position, num_buckets, max_distance):
    # HF T5, bidirectional=False (decoder self-attention)
    rp = -jnp.minimum(relative_position, 0)
    max_exact = num_buckets // 2
    is_small = rp < max_exact
    rp_f = jnp.maximum(rp.astype(jnp.float32), 1.0)
    large = max_exact + (jnp.log(rp_f / max_exact) / math.log(max_distance / max_exact)
                         * (num_buckets - max_exact)).astype(jnp.int32)
    large = jnp.minimum(large, num_buckets - 1)
    return jnp.where(is_small, rp, large)


def _self_attn_bias(rel_table, L):
    """(H, L, L) relative-position bias with the causal mask folded in (f32)."""
    ctx = jnp.arange(L)[:, None]
    mem = jnp.arange(L)[None, :]
    buckets = _relative_position_bucket(mem - ctx, NUM_BUCKETS, MAX_DISTANCE)   # (L, L)
    values = rel_table[buckets]                           # (L, L, H)
    bias = jnp.transpose(values, (2, 0, 1))               # (H, L, L)
    causal = jnp.where(mem <= ctx, 0.0, NEG_INF)          # (L, L), kept in f32
    return bias + causal[None, :, :]


def t5_decoder_forward(params, protein_seq_input_ids, protein_seq_attention_mask, condition):
    # protein_seq_attention_mask is unused in the training forward (matches the
    # reference module: it is never passed to T5_model there).
    del protein_seq_attention_mask
    B, L = protein_seq_input_ids.shape
    BL = B * L

    # labels[labels == pad] = -100
    labels = jnp.where(protein_seq_input_ids == PAD_TOKEN_ID, -100,
                       protein_seq_input_ids).astype(jnp.int32)

    # T5 _shift_right
    dec_ids = jnp.concatenate(
        [jnp.full((B, 1), DECODER_START_TOKEN_ID, jnp.int32), labels[:, :-1]], axis=1)
    dec_ids = jnp.where(dec_ids == -100, PAD_TOKEN_ID, dec_ids)

    self_bias = _self_attn_bias(params["rel_bias"], L)     # (H, L, L)

    inputs = (dec_ids.reshape(BL, 1), labels.reshape(BL, 1),
              condition.astype(jnp.float32),               # (B, hidden_dim)
              params["shared"], params["rep_w"], params["rep_b"], self_bias,
              params["ln_sa"], params["sa_q"], params["sa_k"], params["sa_v"],
              params["sa_o"], params["ca_v"], params["ca_o"],
              params["ln_ff"], params["wi"], params["wo"], params["final_ln"])

    loss = pl.pallas_call(
        _build_fused_kernel(B, L),
        out_shape=jax.ShapeDtypeStruct((1, 1), jnp.float32),
        grid=(1,),
        in_specs=[_full_spec(x.shape) for x in inputs],
        out_specs=pl.BlockSpec((1, 1), lambda i: (0, 0)),
        compiler_params=pltpu.CompilerParams(dimension_semantics=("arbitrary",)),
    )(*inputs)
    return loss[0, 0], 0
    # TODO(synk): inference()/generate() (autoregressive sampling) is not translated.


def init_params(key):
    keys = iter(jax.random.split(key, 16))

    def nrm(shape, scale=0.05):
        return scale * jax.random.normal(next(keys), shape, jnp.float32)

    NL = NUM_LAYERS
    return {
        "rep_w": nrm((HIDDEN_DIM, D_MODEL)),
        "rep_b": nrm((1, D_MODEL)),
        "shared": nrm((VOCAB_SIZE, D_MODEL), 1.0),
        "rel_bias": nrm((NUM_BUCKETS, NUM_HEADS), 0.1),
        "final_ln": jnp.ones((1, D_MODEL), jnp.float32),
        # per-layer weights stacked on a leading layer axis (statically indexed in-kernel)
        "ln_sa": jnp.ones((NL, 1, D_MODEL), jnp.float32),
        "sa_q": nrm((NL, D_MODEL, INNER_DIM)),
        "sa_k": nrm((NL, D_MODEL, INNER_DIM)),
        "sa_v": nrm((NL, D_MODEL, INNER_DIM)),
        "sa_o": nrm((NL, INNER_DIM, D_MODEL)),
        # ln_ca / ca_q / ca_k exist in the reference model but provably do not affect
        # the forward (softmax over the single encoder key == 1); kept for fidelity,
        # unused by the kernel.
        "ln_ca": jnp.ones((NL, 1, D_MODEL), jnp.float32),
        "ca_q": nrm((NL, D_MODEL, INNER_DIM)),
        "ca_k": nrm((NL, D_MODEL, INNER_DIM)),
        "ca_v": nrm((NL, D_MODEL, INNER_DIM)),
        "ca_o": nrm((NL, INNER_DIM, D_MODEL)),
        "ln_ff": jnp.ones((NL, 1, D_MODEL), jnp.float32),
        "wi": nrm((NL, D_MODEL, D_FF)),
        "wo": nrm((NL, D_FF, D_MODEL)),
    }


if __name__ == "__main__":
    key = jax.random.PRNGKey(0)
    pkey, ikey, ckey = jax.random.split(key, 3)
    params = init_params(pkey)

    B, L = 2, 8
    protein_seq_input_ids = jax.random.randint(ikey, (B, L), 1, VOCAB_SIZE, dtype=jnp.int32)
    protein_seq_input_ids = protein_seq_input_ids.at[1, 6:].set(PAD_TOKEN_ID)  # exercise ignore_index
    protein_seq_attention_mask = (protein_seq_input_ids != PAD_TOKEN_ID).astype(jnp.int32)
    condition = jax.random.normal(ckey, (B, HIDDEN_DIM), jnp.float32)

    fwd = jax.jit(t5_decoder_forward)
    loss, aux = fwd(params, protein_seq_input_ids, protein_seq_attention_mask, condition)
    loss = jax.block_until_ready(loss)
    assert bool(jnp.isfinite(loss)), "loss is not finite"
    assert aux == 0
    print("KERNEL_OK")
</pallas_src>

<mosaic_0001>
module attributes {stable_mosaic.version = 11 : i64} {
  func.func @kernel(%arg0: i32, %arg1: memref<16x1xi32, #tpu.memory_space<vmem>>, %arg2: memref<16x1xi32, #tpu.memory_space<vmem>>, %arg3: memref<2x24xf32, #tpu.memory_space<vmem>>, %arg4: memref<16x32xf32, #tpu.memory_space<vmem>>, %arg5: memref<24x32xf32, #tpu.memory_space<vmem>>, %arg6: memref<1x32xf32, #tpu.memory_space<vmem>>, %arg7: memref<4x8x8xf32, #tpu.memory_space<vmem>>, %arg8: memref<2x1x32xf32, #tpu.memory_space<vmem>>, %arg9: memref<2x32x32xf32, #tpu.memory_space<vmem>>, %arg10: memref<2x32x32xf32, #tpu.memory_space<vmem>>, %arg11: memref<2x32x32xf32, #tpu.memory_space<vmem>>, %arg12: memref<2x32x32xf32, #tpu.memory_space<vmem>>, %arg13: memref<2x32x32xf32, #tpu.memory_space<vmem>>, %arg14: memref<2x32x32xf32, #tpu.memory_space<vmem>>, %arg15: memref<2x1x32xf32, #tpu.memory_space<vmem>>, %arg16: memref<2x32x64xf32, #tpu.memory_space<vmem>>, %arg17: memref<2x64x32xf32, #tpu.memory_space<vmem>>, %arg18: memref<1x32xf32, #tpu.memory_space<vmem>>, %arg19: memref<1x1xf32, #tpu.memory_space<vmem>>) attributes {dimension_semantics = [#tpu.dimension_semantics<arbitrary>], iteration_bounds = array<i64: 1>, scalar_prefetch = 0 : i64, scratch_operands = 0 : i64, tpu.core_type = #tpu.core_type<tc>, window_params = [{pipeline_mode = #tpu.pipeline_mode<synchronous>, transform_indices = @transform_0, window_bounds = array<i64: 16, 1>}, {pipeline_mode = #tpu.pipeline_mode<synchronous>, transform_indices = @transform_1, window_bounds = array<i64: 16, 1>}, {pipeline_mode = #tpu.pipeline_mode<synchronous>, transform_indices = @transform_2, window_bounds = array<i64: 2, 24>}, {pipeline_mode = #tpu.pipeline_mode<synchronous>, transform_indices = @transform_3, window_bounds = array<i64: 16, 32>}, {pipeline_mode = #tpu.pipeline_mode<synchronous>, transform_indices = @transform_4, window_bounds = array<i64: 24, 32>}, {pipeline_mode = #tpu.pipeline_mode<synchronous>, transform_indices = @transform_5, window_bounds = array<i64: 1, 32>}, {pipeline_mode = #tpu.pipeline_mode<synchronous>, transform_indices = @transform_6, window_bounds = array<i64: 4, 8, 8>}, {pipeline_mode = #tpu.pipeline_mode<synchronous>, transform_indices = @transform_7, window_bounds = array<i64: 2, 1, 32>}, {pipeline_mode = #tpu.pipeline_mode<synchronous>, transform_indices = @transform_8, window_bounds = array<i64: 2, 32, 32>}, {pipeline_mode = #tpu.pipeline_mode<synchronous>, transform_indices = @transform_9, window_bounds = array<i64: 2, 32, 32>}, {pipeline_mode = #tpu.pipeline_mode<synchronous>, transform_indices = @transform_10, window_bounds = array<i64: 2, 32, 32>}, {pipeline_mode = #tpu.pipeline_mode<synchronous>, transform_indices = @transform_11, window_bounds = array<i64: 2, 32, 32>}, {pipeline_mode = #tpu.pipeline_mode<synchronous>, transform_indices = @transform_12, window_bounds = array<i64: 2, 32, 32>}, {pipeline_mode = #tpu.pipeline_mode<synchronous>, transform_indices = @transform_13, window_bounds = array<i64: 2, 32, 32>}, {pipeline_mode = #tpu.pipeline_mode<synchronous>, transform_indices = @transform_14, window_bounds = array<i64: 2, 1, 32>}, {pipeline_mode = #tpu.pipeline_mode<synchronous>, transform_indices = @transform_15, window_bounds = array<i64: 2, 32, 64>}, {pipeline_mode = #tpu.pipeline_mode<synchronous>, transform_indices = @transform_16, window_bounds = array<i64: 2, 64, 32>}, {pipeline_mode = #tpu.pipeline_mode<synchronous>, transform_indices = @transform_17, window_bounds = array<i64: 1, 32>}, {pipeline_mode = #tpu.pipeline_mode<synchronous>, transform_indices = @transform_18, window_bounds = array<i64: 1, 1>}]} {
    %c0 = arith.constant 0 : index
    %c0_0 = arith.constant 0 : index
    %0 = vector.load %arg1[%c0, %c0_0] : memref<16x1xi32, #tpu.memory_space<vmem>>, vector<16x1xi32>
    %1 = tpu.iota {dimensions = array<i32: 1>} : vector<16x16xi32>
    %2 = vector.broadcast %0 : vector<16x1xi32> to vector<16x16xi32>
    %3 = arith.cmpi eq, %1, %2 : vector<16x16xi32>
    %4 = arith.extui %3 : vector<16x16xi1> to vector<16x16xi32>
    %5 = arith.sitofp %4 : vector<16x16xi32> to vector<16x16xf32>
    %c0_1 = arith.constant 0 : index
    %c0_2 = arith.constant 0 : index
    %6 = vector.load %arg4[%c0_1, %c0_2] : memref<16x32xf32, #tpu.memory_space<vmem>>, vector<16x32xf32>
    %cst = arith.constant dense<0.000000e+00> : vector<16x32xf32>
    %7 = tpu.matmul %5, %6, %cst {dimension_numbers = #tpu.dot_dimension_numbers<[1], [0], [0], [1], [0, 0, 1, 1], [], []>} : vector<16x16xf32>, vector<16x32xf32>, vector<16x32xf32> -> vector<16x32xf32>
    %c0_3 = arith.constant 0 : index
    %c0_4 = arith.constant 0 : index
    %8 = vector.load %arg3[%c0_3, %c0_4] : memref<2x24xf32, #tpu.memory_space<vmem>>, vector<2x24xf32>
    %c0_5 = arith.constant 0 : index
    %c0_6 = arith.constant 0 : index
    %9 = vector.load %arg5[%c0_5, %c0_6] : memref<24x32xf32, #tpu.memory_space<vmem>>, vector<24x32xf32>
    %cst_7 = arith.constant dense<0.000000e+00> : vector<2x32xf32>
    %10 = tpu.matmul %8, %9, %cst_7 {dimension_numbers = #tpu.dot_dimension_numbers<[1], [0], [0], [1], [0, 0, 1, 1], [], []>} : vector<2x24xf32>, vector<24x32xf32>, vector<2x32xf32> -> vector<2x32xf32>
    %c0_8 = arith.constant 0 : index
    %c0_9 = arith.constant 0 : index
    %11 = vector.load %arg6[%c0_8, %c0_9] : memref<1x32xf32, #tpu.memory_space<vmem>>, vector<1x32xf32>
    %12 = vector.broadcast %11 : vector<1x32xf32> to vector<2x32xf32>
    %13 = arith.addf %10, %12 : vector<2x32xf32>
    %c0_10 = arith.constant 0 : index
    %c0_11 = arith.constant 0 : index
    %c0_12 = arith.constant 0 : index
    %14 = vector.load %arg8[%c0_10, %c0_11, %c0_12] : memref<2x1x32xf32, #tpu.memory_space<vmem>>, vector<1x1x32xf32>
    %15 = vector.shape_cast %14 : vector<1x1x32xf32> to vector<1x32xf32>
    %16 = arith.mulf %7, %7 : vector<16x32xf32>
    %cst_13 = arith.constant dense<0.000000e+00> : vector<16xf32>
    %17 = vector.multi_reduction <add>, %16, %cst_13 [1] : vector<16x32xf32> to vector<16xf32>
    %18 = vector.shape_cast %17 : vector<16xf32> to vector<16x1xf32>
    %cst_14 = arith.constant 3.200000e+01 : f32
    %19 = vector.broadcast %cst_14 : f32 to vector<16x1xf32>
    %20 = arith.divf %18, %19 : vector<16x1xf32>
    %cst_15 = arith.constant 9.99999997E-7 : f32
    %21 = vector.broadcast %cst_15 : f32 to vector<16x1xf32>
    %22 = arith.addf %20, %21 : vector<16x1xf32>
    %23 = math.rsqrt %22 : vector<16x1xf32>
    %24 = vector.broadcast %23 : vector<16x1xf32> to vector<16x32xf32>
    %25 = arith.mulf %7, %24 : vector<16x32xf32>
    %26 = vector.broadcast %15 : vector<1x32xf32> to vector<16x32xf32>
    %27 = arith.mulf %25, %26 : vector<16x32xf32>
    %c0_16 = arith.constant 0 : index
    %c0_17 = arith.constant 0 : index
    %c0_18 = arith.constant 0 : index
    %28 = vector.load %arg9[%c0_16, %c0_17, %c0_18] : memref<2x32x32xf32, #tpu.memory_space<vmem>>, vector<1x32x32xf32>
    %29 = vector.shape_cast %28 : vector<1x32x32xf32> to vector<32x32xf32>
    %cst_19 = arith.constant dense<0.000000e+00> : vector<16x32xf32>
    %30 = tpu.matmul %27, %29, %cst_19 {dimension_numbers = #tpu.dot_dimension_numbers<[1], [0], [0], [1], [0, 0, 1, 1], [], []>} : vector<16x32xf32>, vector<32x32xf32>, vector<16x32xf32> -> vector<16x32xf32>
    %c0_20 = arith.constant 0 : index
    %c0_21 = arith.constant 0 : index
    %c0_22 = arith.constant 0 : index
    %31 = vector.load %arg10[%c0_20, %c0_21, %c0_22] : memref<2x32x32xf32, #tpu.memory_space<vmem>>, vector<1x32x32xf32>
    %32 = vector.shape_cast %31 : vector<1x32x32xf32> to vector<32x32xf32>
    %cst_23 = arith.constant dense<0.000000e+00> : vector<16x32xf32>
    %33 = tpu.matmul %27, %32, %cst_23 {dimension_numbers = #tpu.dot_dimension_numbers<[1], [0], [0], [1], [0, 0, 1, 1], [], []>} : vector<16x32xf32>, vector<32x32xf32>, vector<16x32xf32> -> vector<16x32xf32>
    %c0_24 = arith.constant 0 : index
    %c0_25 = arith.constant 0 : index
    %c0_26 = arith.constant 0 : index
    %34 = vector.load %arg11[%c0_24, %c0_25, %c0_26] : memref<2x32x32xf32, #tpu.memory_space<vmem>>, vector<1x32x32xf32>
    %35 = vector.shape_cast %34 : vector<1x32x32xf32> to vector<32x32xf32>
    %cst_27 = arith.constant dense<0.000000e+00> : vector<16x32xf32>
    %36 = tpu.matmul %27, %35, %cst_27 {dimension_numbers = #tpu.dot_dimension_numbers<[1], [0], [0], [1], [0, 0, 1, 1], [], []>} : vector<16x32xf32>, vector<32x32xf32>, vector<16x32xf32> -> vector<16x32xf32>
    %37 = vector.shape_cast %30 : vector<16x32xf32> to vector<2x8x32xf32>
    %38 = vector.shape_cast %33 : vector<16x32xf32> to vector<2x8x32xf32>
    %39 = vector.shape_cast %36 : vector<16x32xf32> to vector<2x8x32xf32>
    %40 = vector.extract_strided_slice %37 {offsets = [0, 0, 0], sizes = [2, 8, 8], strides = [1, 1, 1]} : vector<2x8x32xf32> to vector<2x8x8xf32>
    %41 = vector.extract_strided_slice %38 {offsets = [0, 0, 0], sizes = [2, 8, 8], strides = [1, 1, 1]} : vector<2x8x32xf32> to vector<2x8x8xf32>
    %42 = vector.extract_strided_slice %39 {offsets = [0, 0, 0], sizes = [2, 8, 8], strides = [1, 1, 1]} : vector<2x8x32xf32> to vector<2x8x8xf32>
    "tpu.trace_start"() <{level = 10 : i32, message = "bid,bjd->bij"}> : () -> ()
    %cst_28 = arith.constant dense<0.000000e+00> : vector<2x8x8xf32>
    %43 = tpu.matmul %40, %41, %cst_28 {dimension_numbers = #tpu.dot_dimension_numbers<[2], [2], [1], [1], [0, 0, 0, 1, 1, 1], [0], [0]>} : vector<2x8x8xf32>, vector<2x8x8xf32>, vector<2x8x8xf32> -> vector<2x8x8xf32>
    "tpu.trace_stop"() : () -> ()
    %c0_29 = arith.constant 0 : index
    %c0_30 = arith.constant 0 : index
    %c0_31 = arith.constant 0 : index
    %44 = vector.load %arg7[%c0_29, %c0_30, %c0_31] : memref<4x8x8xf32, #tpu.memory_space<vmem>>, vector<1x8x8xf32>
    %45 = vector.shape_cast %44 : vector<1x8x8xf32> to vector<8x8xf32>
    %46 = vector.shape_cast %45 : vector<8x8xf32> to vector<1x8x8xf32>
    %47 = vector.broadcast %46 : vector<1x8x8xf32> to vector<2x8x8xf32>
    %48 = arith.addf %43, %47 : vector<2x8x8xf32>
    %cst_32 = arith.constant dense<0xFF800000> : vector<2x8xf32>
    %49 = vector.multi_reduction <maximumf>, %48, %cst_32 [2] : vector<2x8x8xf32> to vector<2x8xf32>
    %50 = vector.shape_cast %49 : vector<2x8xf32> to vector<2x8x1xf32>
    %51 = vector.broadcast %50 : vector<2x8x1xf32> to vector<2x8x8xf32>
    %52 = arith.subf %48, %51 : vector<2x8x8xf32>
    %53 = math.exp %52 : vector<2x8x8xf32>
    %cst_33 = arith.constant dense<0.000000e+00> : vector<2x8xf32>
    %54 = vector.multi_reduction <add>, %53, %cst_33 [2] : vector<2x8x8xf32> to vector<2x8xf32>
    %55 = vector.shape_cast %54 : vector<2x8xf32> to vector<2x8x1xf32>
    %56 = tpu.reciprocal %55 {approx = true} : vector<2x8x1xf32> -> vector<2x8x1xf32>
    %57 = vector.broadcast %56 : vector<2x8x1xf32> to vector<2x8x8xf32>
    %58 = arith.mulf %53, %57 : vector<2x8x8xf32>
    "tpu.trace_start"() <{level = 10 : i32, message = "bij,bjd->bid"}> : () -> ()
    %cst_34 = arith.constant dense<0.000000e+00> : vector<2x8x8xf32>
    %59 = tpu.matmul %58, %42, %cst_34 {dimension_numbers = #tpu.dot_dimension_numbers<[2], [1], [1], [2], [0, 0, 0, 1, 1, 2], [0], [0]>} : vector<2x8x8xf32>, vector<2x8x8xf32>, vector<2x8x8xf32> -> vector<2x8x8xf32>
    "tpu.trace_stop"() : () -> ()
    %60 = vector.extract_strided_slice %37 {offsets = [0, 0, 8], sizes = [2, 8, 8], strides = [1, 1, 1]} : vector<2x8x32xf32> to vector<2x8x8xf32>
    %61 = vector.extract_strided_slice %38 {offsets = [0, 0, 8], sizes = [2, 8, 8], strides = [1, 1, 1]} : vector<2x8x32xf32> to vector<2x8x8xf32>
    %62 = vector.extract_strided_slice %39 {offsets = [0, 0, 8], sizes = [2, 8, 8], strides = [1, 1, 1]} : vector<2x8x32xf32> to vector<2x8x8xf32>
    "tpu.trace_start"() <{level = 10 : i32, message = "bid,bjd->bij"}> : () -> ()
    %cst_35 = arith.constant dense<0.000000e+00> : vector<2x8x8xf32>
    %63 = tpu.matmul %60, %61, %cst_35 {dimension_numbers = #tpu.dot_dimension_numbers<[2], [2], [1], [1], [0, 0, 0, 1, 1, 1], [0], [0]>} : vector<2x8x8xf32>, vector<2x8x8xf32>, vector<2x8x8xf32> -> vector<2x8x8xf32>
    "tpu.trace_stop"() : () -> ()
    %c1 = arith.constant 1 : index
    %c0_36 = arith.constant 0 : index
    %c0_37 = arith.constant 0 : index
    %64 = vector.load %arg7[%c1, %c0_36, %c0_37] : memref<4x8x8xf32, #tpu.memory_space<vmem>>, vector<1x8x8xf32>
    %65 = vector.shape_cast %64 : vector<1x8x8xf32> to vector<8x8xf32>
    %66 = vector.shape_cast %65 : vector<8x8xf32> to vector<1x8x8xf32>
    %67 = vector.broadcast %66 : vector<1x8x8xf32> to vector<2x8x8xf32>
    %68 = arith.addf %63, %67 : vector<2x8x8xf32>
    %cst_38 = arith.constant dense<0xFF800000> : vector<2x8xf32>
    %69 = vector.multi_reduction <maximumf>, %68, %cst_38 [2] : vector<2x8x8xf32> to vector<2x8xf32>
    %70 = vector.shape_cast %69 : vector<2x8xf32> to vector<2x8x1xf32>
    %71 = vector.broadcast %70 : vector<2x8x1xf32> to vector<2x8x8xf32>
    %72 = arith.subf %68, %71 : vector<2x8x8xf32>
    %73 = math.exp %72 : vector<2x8x8xf32>
    %cst_39 = arith.constant dense<0.000000e+00> : vector<2x8xf32>
    %74 = vector.multi_reduction <add>, %73, %cst_39 [2] : vector<2x8x8xf32> to vector<2x8xf32>
    %75 = vector.shape_cast %74 : vector<2x8xf32> to vector<2x8x1xf32>
    %76 = tpu.reciprocal %75 {approx = true} : vector<2x8x1xf32> -> vector<2x8x1xf32>
    %77 = vector.broadcast %76 : vector<2x8x1xf32> to vector<2x8x8xf32>
    %78 = arith.mulf %73, %77 : vector<2x8x8xf32>
    "tpu.trace_start"() <{level = 10 : i32, message = "bij,bjd->bid"}> : () -> ()
    %cst_40 = arith.constant dense<0.000000e+00> : vector<2x8x8xf32>
    %79 = tpu.matmul %78, %62, %cst_40 {dimension_numbers = #tpu.dot_dimension_numbers<[2], [1], [1], [2], [0, 0, 0, 1, 1, 2], [0], [0]>} : vector<2x8x8xf32>, vector<2x8x8xf32>, vector<2x8x8xf32> -> vector<2x8x8xf32>
    "tpu.trace_stop"() : () -> ()
    %80 = vector.extract_strided_slice %37 {offsets = [0, 0, 16], sizes = [2, 8, 8], strides = [1, 1, 1]} : vector<2x8x32xf32> to vector<2x8x8xf32>
    %81 = vector.extract_strided_slice %38 {offsets = [0, 0, 16], sizes = [2, 8, 8], strides = [1, 1, 1]} : vector<2x8x32xf32> to vector<2x8x8xf32>
    %82 = vector.extract_strided_slice %39 {offsets = [0, 0, 16], sizes = [2, 8, 8], strides = [1, 1, 1]} : vector<2x8x32xf32> to vector<2x8x8xf32>
    "tpu.trace_start"() <{level = 10 : i32, message = "bid,bjd->bij"}> : () -> ()
    %cst_41 = arith.constant dense<0.000000e+00> : vector<2x8x8xf32>
    %83 = tpu.matmul %80, %81, %cst_41 {dimension_numbers = #tpu.dot_dimension_numbers<[2], [2], [1], [1], [0, 0, 0, 1, 1, 1], [0], [0]>} : vector<2x8x8xf32>, vector<2x8x8xf32>, vector<2x8x8xf32> -> vector<2x8x8xf32>
    "tpu.trace_stop"() : () -> ()
    %c2 = arith.constant 2 : index
    %c0_42 = arith.constant 0 : index
    %c0_43 = arith.constant 0 : index
    %84 = vector.load %arg7[%c2, %c0_42, %c0_43] : memref<4x8x8xf32, #tpu.memory_space<vmem>>, vector<1x8x8xf32>
    %85 = vector.shape_cast %84 : vector<1x8x8xf32> to vector<8x8xf32>
    %86 = vector.shape_cast %85 : vector<8x8xf32> to vector<1x8x8xf32>
    %87 = vector.broadcast %86 : vector<1x8x8xf32> to vector<2x8x8xf32>
    %88 = arith.addf %83, %87 : vector<2x8x8xf32>
    %cst_44 = arith.constant dense<0xFF800000> : vector<2x8xf32>
    %89 = vector.multi_reduction <maximumf>, %88, %cst_44 [2] : vector<2x8x8xf32> to vector<2x8xf32>
    %90 = vector.shape_cast %89 : vector<2x8xf32> to vector<2x8x1xf32>
    %91 = vector.broadcast %90 : vector<2x8x1xf32> to vector<2x8x8xf32>
    %92 = arith.subf %88, %91 : vector<2x8x8xf32>
    %93 = math.exp %92 : vector<2x8x8xf32>
    %cst_45 = arith.constant dense<0.000000e+00> : vector<2x8xf32>
    %94 = vector.multi_reduction <add>, %93, %cst_45 [2] : vector<2x8x8xf32> to vector<2x8xf32>
    %95 = vector.shape_cast %94 : vector<2x8xf32> to vector<2x8x1xf32>
    %96 = tpu.reciprocal %95 {approx = true} : vector<2x8x1xf32> -> vector<2x8x1xf32>
    %97 = vector.broadcast %96 : vector<2x8x1xf32> to vector<2x8x8xf32>
    %98 = arith.mulf %93, %97 : vector<2x8x8xf32>
    "tpu.trace_start"() <{level = 10 : i32, message = "bij,bjd->bid"}> : () -> ()
    %cst_46 = arith.constant dense<0.000000e+00> : vector<2x8x8xf32>
    %99 = tpu.matmul %98, %82, %cst_46 {dimension_numbers = #tpu.dot_dimension_numbers<[2], [1], [1], [2], [0, 0, 0, 1, 1, 2], [0], [0]>} : vector<2x8x8xf32>, vector<2x8x8xf32>, vector<2x8x8xf32> -> vector<2x8x8xf32>
    "tpu.trace_stop"() : () -> ()
    %100 = vector.extract_strided_slice %37 {offsets = [0, 0, 24], sizes = [2, 8, 8], strides = [1, 1, 1]} : vector<2x8x32xf32> to vector<2x8x8xf32>
    %101 = vector.extract_strided_slice %38 {offsets = [0, 0, 24], sizes = [2, 8, 8], strides = [1, 1, 1]} : vector<2x8x32xf32> to vector<2x8x8xf32>
    %102 = vector.extract_strided_slice %39 {offsets = [0, 0, 24], sizes = [2, 8, 8], strides = [1, 1, 1]} : vector<2x8x32xf32> to vector<2x8x8xf32>
    "tpu.trace_start"() <{level = 10 : i32, message = "bid,bjd->bij"}> : () -> ()
    %cst_47 = arith.constant dense<0.000000e+00> : vector<2x8x8xf32>
    %103 = tpu.matmul %100, %101, %cst_47 {dimension_numbers = #tpu.dot_dimension_numbers<[2], [2], [1], [1], [0, 0, 0, 1, 1, 1], [0], [0]>} : vector<2x8x8xf32>, vector<2x8x8xf32>, vector<2x8x8xf32> -> vector<2x8x8xf32>
    "tpu.trace_stop"() : () -> ()
    %c3 = arith.constant 3 : index
    %c0_48 = arith.constant 0 : index
    %c0_49 = arith.constant 0 : index
    %104 = vector.load %arg7[%c3, %c0_48, %c0_49] : memref<4x8x8xf32, #tpu.memory_space<vmem>>, vector<1x8x8xf32>
    %105 = vector.shape_cast %104 : vector<1x8x8xf32> to vector<8x8xf32>
    %106 = vector.shape_cast %105 : vector<8x8xf32> to vector<1x8x8xf32>
    %107 = vector.broadcast %106 : vector<1x8x8xf32> to vector<2x8x8xf32>
    %108 = arith.addf %103, %107 : vector<2x8x8xf32>
    %cst_50 = arith.constant dense<0xFF800000> : vector<2x8xf32>
    %109 = vector.multi_reduction <maximumf>, %108, %cst_50 [2] : vector<2x8x8xf32> to vector<2x8xf32>
    %110 = vector.shape_cast %109 : vector<2x8xf32> to vector<2x8x1xf32>
    %111 = vector.broadcast %110 : vector<2x8x1xf32> to vector<2x8x8xf32>
    %112 = arith.subf %108, %111 : vector<2x8x8xf32>
    %113 = math.exp %112 : vector<2x8x8xf32>
    %cst_51 = arith.constant dense<0.000000e+00> : vector<2x8xf32>
    %114 = vector.multi_reduction <add>, %113, %cst_51 [2] : vector<2x8x8xf32> to vector<2x8xf32>
    %115 = vector.shape_cast %114 : vector<2x8xf32> to vector<2x8x1xf32>
    %116 = tpu.reciprocal %115 {approx = true} : vector<2x8x1xf32> -> vector<2x8x1xf32>
    %117 = vector.broadcast %116 : vector<2x8x1xf32> to vector<2x8x8xf32>
    %118 = arith.mulf %113, %117 : vector<2x8x8xf32>
    "tpu.trace_start"() <{level = 10 : i32, message = "bij,bjd->bid"}> : () -> ()
    %cst_52 = arith.constant dense<0.000000e+00> : vector<2x8x8xf32>
    %119 = tpu.matmul %118, %102, %cst_52 {dimension_numbers = #tpu.dot_dimension_numbers<[2], [1], [1], [2], [0, 0, 0, 1, 1, 2], [0], [0]>} : vector<2x8x8xf32>, vector<2x8x8xf32>, vector<2x8x8xf32> -> vector<2x8x8xf32>
    "tpu.trace_stop"() : () -> ()
    %120 = tpu.concatenate %59, %79, %99, %119 in 2 : vector<2x8x8xf32>, vector<2x8x8xf32>, vector<2x8x8xf32>, vector<2x8x8xf32> -> vector<2x8x32xf32>
    %121 = vector.shape_cast %120 : vector<2x8x32xf32> to vector<16x32xf32>
    %c0_53 = arith.constant 0 : index
    %c0_54 = arith.constant 0 : index
    %c0_55 = arith.constant 0 : index
    %122 = vector.load %arg12[%c0_53, %c0_54, %c0_55] : memref<2x32x32xf32, #tpu.memory_space<vmem>>, vector<1x32x32xf32>
    %123 = vector.shape_cast %122 : vector<1x32x32xf32> to vector<32x32xf32>
    %cst_56 = arith.constant dense<0.000000e+00> : vector<16x32xf32>
    %124 = tpu.matmul %121, %123, %cst_56 {dimension_numbers = #tpu.dot_dimension_numbers<[1], [0], [0], [1], [0, 0, 1, 1], [], []>} : vector<16x32xf32>, vector<32x32xf32>, vector<16x32xf32> -> vector<16x32xf32>
    %125 = arith.addf %7, %124 : vector<16x32xf32>
    %c0_57 = arith.constant 0 : index
    %c0_58 = arith.constant 0 : index
    %c0_59 = arith.constant 0 : index
    %126 = vector.load %arg13[%c0_57, %c0_58, %c0_59] : memref<2x32x32xf32, #tpu.memory_space<vmem>>, vector<1x32x32xf32>
    %127 = vector.shape_cast %126 : vector<1x32x32xf32> to vector<32x32xf32>
    %cst_60 = arith.constant dense<0.000000e+00> : vector<2x32xf32>
    %128 = tpu.matmul %13, %127, %cst_60 {dimension_numbers = #tpu.dot_dimension_numbers<[1], [0], [0], [1], [0, 0, 1, 1], [], []>} : vector<2x32xf32>, vector<32x32xf32>, vector<2x32xf32> -> vector<2x32xf32>
    %c0_61 = arith.constant 0 : index
    %c0_62 = arith.constant 0 : index
    %c0_63 = arith.constant 0 : index
    %129 = vector.load %arg14[%c0_61, %c0_62, %c0_63] : memref<2x32x32xf32, #tpu.memory_space<vmem>>, vector<1x32x32xf32>
    %130 = vector.shape_cast %129 : vector<1x32x32xf32> to vector<32x32xf32>
    %cst_64 = arith.constant dense<0.000000e+00> : vector<2x32xf32>
    %131 = tpu.matmul %128, %130, %cst_64 {dimension_numbers = #tpu.dot_dimension_numbers<[1], [0], [0], [1], [0, 0, 1, 1], [], []>} : vector<2x32xf32>, vector<32x32xf32>, vector<2x32xf32> -> vector<2x32xf32>
    %132 = vector.shape_cast %125 : vector<16x32xf32> to vector<2x8x32xf32>
    %133 = vector.shape_cast %131 : vector<2x32xf32> to vector<2x1x32xf32>
    %134 = vector.broadcast %133 : vector<2x1x32xf32> to vector<2x8x32xf32>
    %135 = arith.addf %132, %134 : vector<2x8x32xf32>
    %136 = vector.shape_cast %135 : vector<2x8x32xf32> to vector<16x32xf32>
    %c0_65 = arith.constant 0 : index
    %c0_66 = arith.constant 0 : index
    %c0_67 = arith.constant 0 : index
    %137 = vector.load %arg15[%c0_65, %c0_66, %c0_67] : memref<2x1x32xf32, #tpu.memory_space<vmem>>, vector<1x1x32xf32>
    %138 = vector.shape_cast %137 : vector<1x1x32xf32> to vector<1x32xf32>
    %139 = arith.mulf %136, %136 : vector<16x32xf32>
    %cst_68 = arith.constant dense<0.000000e+00> : vector<16xf32>
    %140 = vector.multi_reduction <add>, %139, %cst_68 [1] : vector<16x32xf32> to vector<16xf32>
    %141 = vector.shape_cast %140 : vector<16xf32> to vector<16x1xf32>
    %cst_69 = arith.constant 3.200000e+01 : f32
    %142 = vector.broadcast %cst_69 : f32 to vector<16x1xf32>
    %143 = arith.divf %141, %142 : vector<16x1xf32>
    %cst_70 = arith.constant 9.99999997E-7 : f32
    %144 = vector.broadcast %cst_70 : f32 to vector<16x1xf32>
    %145 = arith.addf %143, %144 : vector<16x1xf32>
    %146 = math.rsqrt %145 : vector<16x1xf32>
    %147 = vector.broadcast %146 : vector<16x1xf32> to vector<16x32xf32>
    %148 = arith.mulf %136, %147 : vector<16x32xf32>
    %149 = vector.broadcast %138 : vector<1x32xf32> to vector<16x32xf32>
    %150 = arith.mulf %148, %149 : vector<16x32xf32>
    %c0_71 = arith.constant 0 : index
    %c0_72 = arith.constant 0 : index
    %c0_73 = arith.constant 0 : index
    %151 = vector.load %arg16[%c0_71, %c0_72, %c0_73] : memref<2x32x64xf32, #tpu.memory_space<vmem>>, vector<1x32x64xf32>
    %152 = vector.shape_cast %151 : vector<1x32x64xf32> to vector<32x64xf32>
    %cst_74 = arith.constant dense<0.000000e+00> : vector<16x64xf32>
    %153 = tpu.matmul %150, %152, %cst_74 {dimension_numbers = #tpu.dot_dimension_numbers<[1], [0], [0], [1], [0, 0, 1, 1], [], []>} : vector<16x32xf32>, vector<32x64xf32>, vector<16x64xf32> -> vector<16x64xf32>
    %cst_75 = arith.constant 0.000000e+00 : f32
    %154 = vector.broadcast %cst_75 : f32 to vector<16x64xf32>
    %155 = arith.maximumf %153, %154 : vector<16x64xf32>
    %c0_76 = arith.constant 0 : index
    %c0_77 = arith.constant 0 : index
    %c0_78 = arith.constant 0 : index
    %156 = vector.load %arg17[%c0_76, %c0_77, %c0_78] : memref<2x64x32xf32, #tpu.memory_space<vmem>>, vector<1x64x32xf32>
    %157 = vector.shape_cast %156 : vector<1x64x32xf32> to vector<64x32xf32>
    %cst_79 = arith.constant dense<0.000000e+00> : vector<16x32xf32>
    %158 = tpu.matmul %155, %157, %cst_79 {dimension_numbers = #tpu.dot_dimension_numbers<[1], [0], [0], [1], [0, 0, 1, 1], [], []>} : vector<16x64xf32>, vector<64x32xf32>, vector<16x32xf32> -> vector<16x32xf32>
    %159 = arith.addf %136, %158 : vector<16x32xf32>
    %c1_80 = arith.constant 1 : index
    %c0_81 = arith.constant 0 : index
    %c0_82 = arith.constant 0 : index
    %160 = vector.load %arg8[%c1_80, %c0_81, %c0_82] : memref<2x1x32xf32, #tpu.memory_space<vmem>>, vector<1x1x32xf32>
    %161 = vector.shape_cast %160 : vector<1x1x32xf32> to vector<1x32xf32>
    %162 = arith.mulf %159, %159 : vector<16x32xf32>
    %cst_83 = arith.constant dense<0.000000e+00> : vector<16xf32>
    %163 = vector.multi_reduction <add>, %162, %cst_83 [1] : vector<16x32xf32> to vector<16xf32>
    %164 = vector.shape_cast %163 : vector<16xf32> to vector<16x1xf32>
    %cst_84 = arith.constant 3.200000e+01 : f32
    %165 = vector.broadcast %cst_84 : f32 to vector<16x1xf32>
    %166 = arith.divf %164, %165 : vector<16x1xf32>
    %cst_85 = arith.constant 9.99999997E-7 : f32
    %167 = vector.broadcast %cst_85 : f32 to vector<16x1xf32>
    %168 = arith.addf %166, %167 : vector<16x1xf32>
    %169 = math.rsqrt %168 : vector<16x1xf32>
    %170 = vector.broadcast %169 : vector<16x1xf32> to vector<16x32xf32>
    %171 = arith.mulf %159, %170 : vector<16x32xf32>
    %172 = vector.broadcast %161 : vector<1x32xf32> to vector<16x32xf32>
    %173 = arith.mulf %171, %172 : vector<16x32xf32>
    %c1_86 = arith.constant 1 : index
    %c0_87 = arith.constant 0 : index
    %c0_88 = arith.constant 0 : index
    %174 = vector.load %arg9[%c1_86, %c0_87, %c0_88] : memref<2x32x32xf32, #tpu.memory_space<vmem>>, vector<1x32x32xf32>
    %175 = vector.shape_cast %174 : vector<1x32x32xf32> to vector<32x32xf32>
    %cst_89 = arith.constant dense<0.000000e+00> : vector<16x32xf32>
    %176 = tpu.matmul %173, %175, %cst_89 {dimension_numbers = #tpu.dot_dimension_numbers<[1], [0], [0], [1], [0, 0, 1, 1], [], []>} : vector<16x32xf32>, vector<32x32xf32>, vector<16x32xf32> -> vector<16x32xf32>
    %c1_90 = arith.constant 1 : index
    %c0_91 = arith.constant 0 : index
    %c0_92 = arith.constant 0 : index
    %177 = vector.load %arg10[%c1_90, %c0_91, %c0_92] : memref<2x32x32xf32, #tpu.memory_space<vmem>>, vector<1x32x32xf32>
    %178 = vector.shape_cast %177 : vector<1x32x32xf32> to vector<32x32xf32>
    %cst_93 = arith.constant dense<0.000000e+00> : vector<16x32xf32>
    %179 = tpu.matmul %173, %178, %cst_93 {dimension_numbers = #tpu.dot_dimension_numbers<[1], [0], [0], [1], [0, 0, 1, 1], [], []>} : vector<16x32xf32>, vector<32x32xf32>, vector<16x32xf32> -> vector<16x32xf32>
    %c1_94 = arith.constant 1 : index
    %c0_95 = arith.constant 0 : index
    %c0_96 = arith.constant 0 : index
    %180 = vector.load %arg11[%c1_94, %c0_95, %c0_96] : memref<2x32x32xf32, #tpu.memory_space<vmem>>, vector<1x32x32xf32>
    %181 = vector.shape_cast %180 : vector<1x32x32xf32> to vector<32x32xf32>
    %cst_97 = arith.constant dense<0.000000e+00> : vector<16x32xf32>
    %182 = tpu.matmul %173, %181, %cst_97 {dimension_numbers = #tpu.dot_dimension_numbers<[1], [0], [0], [1], [0, 0, 1, 1], [], []>} : vector<16x32xf32>, vector<32x32xf32>, vector<16x32xf32> -> vector<16x32xf32>
    %183 = vector.shape_cast %176 : vector<16x32xf32> to vector<2x8x32xf32>
    %184 = vector.shape_cast %179 : vector<16x32xf32> to vector<2x8x32xf32>
    %185 = vector.shape_cast %182 : vector<16x32xf32> to vector<2x8x32xf32>
    %186 = vector.extract_strided_slice %183 {offsets = [0, 0, 0], sizes = [2, 8, 8], strides = [1, 1, 1]} : vector<2x8x32xf32> to vector<2x8x8xf32>
    %187 = vector.extract_strided_slice %184 {offsets = [0, 0, 0], sizes = [2, 8, 8], strides = [1, 1, 1]} : vector<2x8x32xf32> to vector<2x8x8xf32>
    %188 = vector.extract_strided_slice %185 {offsets = [0, 0, 0], sizes = [2, 8, 8], strides = [1, 1, 1]} : vector<2x8x32xf32> to vector<2x8x8xf32>
    "tpu.trace_start"() <{level = 10 : i32, message = "bid,bjd->bij"}> : () -> ()
    %cst_98 = arith.constant dense<0.000000e+00> : vector<2x8x8xf32>
    %189 = tpu.matmul %186, %187, %cst_98 {dimension_numbers = #tpu.dot_dimension_numbers<[2], [2], [1], [1], [0, 0, 0, 1, 1, 1], [0], [0]>} : vector<2x8x8xf32>, vector<2x8x8xf32>, vector<2x8x8xf32> -> vector<2x8x8xf32>
    "tpu.trace_stop"() : () -> ()
    %c0_99 = arith.constant 0 : index
    %c0_100 = arith.constant 0 : index
    %c0_101 = arith.constant 0 : index
    %190 = vector.load %arg7[%c0_99, %c0_100, %c0_101] : memref<4x8x8xf32, #tpu.memory_space<vmem>>, vector<1x8x8xf32>
    %191 = vector.shape_cast %190 : vector<1x8x8xf32> to vector<8x8xf32>
    %192 = vector.shape_cast %191 : vector<8x8xf32> to vector<1x8x8xf32>
    %193 = vector.broadcast %192 : vector<1x8x8xf32> to vector<2x8x8xf32>
    %194 = arith.addf %189, %193 : vector<2x8x8xf32>
    %cst_102 = arith.constant dense<0xFF800000> : vector<2x8xf32>
    %195 = vector.multi_reduction <maximumf>, %194, %cst_102 [2] : vector<2x8x8xf32> to vector<2x8xf32>
    %196 = vector.shape_cast %195 : vector<2x8xf32> to vector<2x8x1xf32>
    %197 = vector.broadcast %196 : vector<2x8x1xf32> to vector<2x8x8xf32>
    %198 = arith.subf %194, %197 : vector<2x8x8xf32>
    %199 = math.exp %198 : vector<2x8x8xf32>
    %cst_103 = arith.constant dense<0.000000e+00> : vector<2x8xf32>
    %200 = vector.multi_reduction <add>, %199, %cst_103 [2] : vector<2x8x8xf32> to vector<2x8xf32>
    %201 = vector.shape_cast %200 : vector<2x8xf32> to vector<2x8x1xf32>
    %202 = tpu.reciprocal %201 {approx = true} : vector<2x8x1xf32> -> vector<2x8x1xf32>
    %203 = vector.broadcast %202 : vector<2x8x1xf32> to vector<2x8x8xf32>
    %204 = arith.mulf %199, %203 : vector<2x8x8xf32>
    "tpu.trace_start"() <{level = 10 : i32, message = "bij,bjd->bid"}> : () -> ()
    %cst_104 = arith.constant dense<0.000000e+00> : vector<2x8x8xf32>
    %205 = tpu.matmul %204, %188, %cst_104 {dimension_numbers = #tpu.dot_dimension_numbers<[2], [1], [1], [2], [0, 0, 0, 1, 1, 2], [0], [0]>} : vector<2x8x8xf32>, vector<2x8x8xf32>, vector<2x8x8xf32> -> vector<2x8x8xf32>
    "tpu.trace_stop"() : () -> ()
    %206 = vector.extract_strided_slice %183 {offsets = [0, 0, 8], sizes = [2, 8, 8], strides = [1, 1, 1]} : vector<2x8x32xf32> to vector<2x8x8xf32>
    %207 = vector.extract_strided_slice %184 {offsets = [0, 0, 8], sizes = [2, 8, 8], strides = [1, 1, 1]} : vector<2x8x32xf32> to vector<2x8x8xf32>
    %208 = vector.extract_strided_slice %185 {offsets = [0, 0, 8], sizes = [2, 8, 8], strides = [1, 1, 1]} : vector<2x8x32xf32> to vector<2x8x8xf32>
    "tpu.trace_start"() <{level = 10 : i32, message = "bid,bjd->bij"}> : () -> ()
    %cst_105 = arith.constant dense<0.000000e+00> : vector<2x8x8xf32>
    %209 = tpu.matmul %206, %207, %cst_105 {dimension_numbers = #tpu.dot_dimension_numbers<[2], [2], [1], [1], [0, 0, 0, 1, 1, 1], [0], [0]>} : vector<2x8x8xf32>, vector<2x8x8xf32>, vector<2x8x8xf32> -> vector<2x8x8xf32>
    "tpu.trace_stop"() : () -> ()
    %c1_106 = arith.constant 1 : index
    %c0_107 = arith.constant 0 : index
    %c0_108 = arith.constant 0 : index
    %210 = vector.load %arg7[%c1_106, %c0_107, %c0_108] : memref<4x8x8xf32, #tpu.memory_space<vmem>>, vector<1x8x8xf32>
    %211 = vector.shape_cast %210 : vector<1x8x8xf32> to vector<8x8xf32>
    %212 = vector.shape_cast %211 : vector<8x8xf32> to vector<1x8x8xf32>
    %213 = vector.broadcast %212 : vector<1x8x8xf32> to vector<2x8x8xf32>
    %214 = arith.addf %209, %213 : vector<2x8x8xf32>
    %cst_109 = arith.constant dense<0xFF800000> : vector<2x8xf32>
    %215 = vector.multi_reduction <maximumf>, %214, %cst_109 [2] : vector<2x8x8xf32> to vector<2x8xf32>
    %216 = vector.shape_cast %215 : vector<2x8xf32> to vector<2x8x1xf32>
    %217 = vector.broadcast %216 : vector<2x8x1xf32> to vector<2x8x8xf32>
    %218 = arith.subf %214, %217 : vector<2x8x8xf32>
    %219 = math.exp %218 : vector<2x8x8xf32>
    %cst_110 = arith.constant dense<0.000000e+00> : vector<2x8xf32>
    %220 = vector.multi_reduction <add>, %219, %cst_110 [2] : vector<2x8x8xf32> to vector<2x8xf32>
    %221 = vector.shape_cast %220 : vector<2x8xf32> to vector<2x8x1xf32>
    %222 = tpu.reciprocal %221 {approx = true} : vector<2x8x1xf32> -> vector<2x8x1xf32>
    %223 = vector.broadcast %222 : vector<2x8x1xf32> to vector<2x8x8xf32>
    %224 = arith.mulf %219, %223 : vector<2x8x8xf32>
    "tpu.trace_start"() <{level = 10 : i32, message = "bij,bjd->bid"}> : () -> ()
    %cst_111 = arith.constant dense<0.000000e+00> : vector<2x8x8xf32>
    %225 = tpu.matmul %224, %208, %cst_111 {dimension_numbers = #tpu.dot_dimension_numbers<[2], [1], [1], [2], [0, 0, 0, 1, 1, 2], [0], [0]>} : vector<2x8x8xf32>, vector<2x8x8xf32>, vector<2x8x8xf32> -> vector<2x8x8xf32>
    "tpu.trace_stop"() : () -> ()
    %226 = vector.extract_strided_slice %183 {offsets = [0, 0, 16], sizes = [2, 8, 8], strides = [1, 1, 1]} : vector<2x8x32xf32> to vector<2x8x8xf32>
    %227 = vector.extract_strided_slice %184 {offsets = [0, 0, 16], sizes = [2, 8, 8], strides = [1, 1, 1]} : vector<2x8x32xf32> to vector<2x8x8xf32>
    %228 = vector.extract_strided_slice %185 {offsets = [0, 0, 16], sizes = [2, 8, 8], strides = [1, 1, 1]} : vector<2x8x32xf32> to vector<2x8x8xf32>
    "tpu.trace_start"() <{level = 10 : i32, message = "bid,bjd->bij"}> : () -> ()
    %cst_112 = arith.constant dense<0.000000e+00> : vector<2x8x8xf32>
    %229 = tpu.matmul %226, %227, %cst_112 {dimension_numbers = #tpu.dot_dimension_numbers<[2], [2], [1], [1], [0, 0, 0, 1, 1, 1], [0], [0]>} : vector<2x8x8xf32>, vector<2x8x8xf32>, vector<2x8x8xf32> -> vector<2x8x8xf32>
    "tpu.trace_stop"() : () -> ()
    %c2_113 = arith.constant 2 : index
    %c0_114 = arith.constant 0 : index
    %c0_115 = arith.constant 0 : index
    %230 = vector.load %arg7[%c2_113, %c0_114, %c0_115] : memref<4x8x8xf32, #tpu.memory_space<vmem>>, vector<1x8x8xf32>
    %231 = vector.shape_cast %230 : vector<1x8x8xf32> to vector<8x8xf32>
    %232 = vector.shape_cast %231 : vector<8x8xf32> to vector<1x8x8xf32>
    %233 = vector.broadcast %232 : vector<1x8x8xf32> to vector<2x8x8xf32>
    %234 = arith.addf %229, %233 : vector<2x8x8xf32>
    %cst_116 = arith.constant dense<0xFF800000> : vector<2x8xf32>
    %235 = vector.multi_reduction <maximumf>, %234, %cst_116 [2] : vector<2x8x8xf32> to vector<2x8xf32>
    %236 = vector.shape_cast %235 : vector<2x8xf32> to vector<2x8x1xf32>
    %237 = vector.broadcast %236 : vector<2x8x1xf32> to vector<2x8x8xf32>
    %238 = arith.subf %234, %237 : vector<2x8x8xf32>
    %239 = math.exp %238 : vector<2x8x8xf32>
    %cst_117 = arith.constant dense<0.000000e+00> : vector<2x8xf32>
    %240 = vector.multi_reduction <add>, %239, %cst_117 [2] : vector<2x8x8xf32> to vector<2x8xf32>
    %241 = vector.shape_cast %240 : vector<2x8xf32> to vector<2x8x1xf32>
    %242 = tpu.reciprocal %241 {approx = true} : vector<2x8x1xf32> -> vector<2x8x1xf32>
    %243 = vector.broadcast %242 : vector<2x8x1xf32> to vector<2x8x8xf32>
    %244 = arith.mulf %239, %243 : vector<2x8x8xf32>
    "tpu.trace_start"() <{level = 10 : i32, message = "bij,bjd->bid"}> : () -> ()
    %cst_118 = arith.constant dense<0.000000e+00> : vector<2x8x8xf32>
    %245 = tpu.matmul %244, %228, %cst_118 {dimension_numbers = #tpu.dot_dimension_numbers<[2], [1], [1], [2], [0, 0, 0, 1, 1, 2], [0], [0]>} : vector<2x8x8xf32>, vector<2x8x8xf32>, vector<2x8x8xf32> -> vector<2x8x8xf32>
    "tpu.trace_stop"() : () -> ()
    %246 = vector.extract_strided_slice %183 {offsets = [0, 0, 24], sizes = [2, 8, 8], strides = [1, 1, 1]} : vector<2x8x32xf32> to vector<2x8x8xf32>
    %247 = vector.extract_strided_slice %184 {offsets = [0, 0, 24], sizes = [2, 8, 8], strides = [1, 1, 1]} : vector<2x8x32xf32> to vector<2x8x8xf32>
    %248 = vector.extract_strided_slice %185 {offsets = [0, 0, 24], sizes = [2, 8, 8], strides = [1, 1, 1]} : vector<2x8x32xf32> to vector<2x8x8xf32>
    "tpu.trace_start"() <{level = 10 : i32, message = "bid,bjd->bij"}> : () -> ()
    %cst_119 = arith.constant dense<0.000000e+00> : vector<2x8x8xf32>
    %249 = tpu.matmul %246, %247, %cst_119 {dimension_numbers = #tpu.dot_dimension_numbers<[2], [2], [1], [1], [0, 0, 0, 1, 1, 1], [0], [0]>} : vector<2x8x8xf32>, vector<2x8x8xf32>, vector<2x8x8xf32> -> vector<2x8x8xf32>
    "tpu.trace_stop"() : () -> ()
    %c3_120 = arith.constant 3 : index
    %c0_121 = arith.constant 0 : index
    %c0_122 = arith.constant 0 : index
    %250 = vector.load %arg7[%c3_120, %c0_121, %c0_122] : memref<4x8x8xf32, #tpu.memory_space<vmem>>, vector<1x8x8xf32>
    %251 = vector.shape_cast %250 : vector<1x8x8xf32> to vector<8x8xf32>
    %252 = vector.shape_cast %251 : vector<8x8xf32> to vector<1x8x8xf32>
    %253 = vector.broadcast %252 : vector<1x8x8xf32> to vector<2x8x8xf32>
    %254 = arith.addf %249, %253 : vector<2x8x8xf32>
    %cst_123 = arith.constant dense<0xFF800000> : vector<2x8xf32>
    %255 = vector.multi_reduction <maximumf>, %254, %cst_123 [2] : vector<2x8x8xf32> to vector<2x8xf32>
    %256 = vector.shape_cast %255 : vector<2x8xf32> to vector<2x8x1xf32>
    %257 = vector.broadcast %256 : vector<2x8x1xf32> to vector<2x8x8xf32>
    %258 = arith.subf %254, %257 : vector<2x8x8xf32>
    %259 = math.exp %258 : vector<2x8x8xf32>
    %cst_124 = arith.constant dense<0.000000e+00> : vector<2x8xf32>
    %260 = vector.multi_reduction <add>, %259, %cst_124 [2] : vector<2x8x8xf32> to vector<2x8xf32>
    %261 = vector.shape_cast %260 : vector<2x8xf32> to vector<2x8x1xf32>
    %262 = tpu.reciprocal %261 {approx = true} : vector<2x8x1xf32> -> vector<2x8x1xf32>
    %263 = vector.broadcast %262 : vector<2x8x1xf32> to vector<2x8x8xf32>
    %264 = arith.mulf %259, %263 : vector<2x8x8xf32>
    "tpu.trace_start"() <{level = 10 : i32, message = "bij,bjd->bid"}> : () -> ()
    %cst_125 = arith.constant dense<0.000000e+00> : vector<2x8x8xf32>
    %265 = tpu.matmul %264, %248, %cst_125 {dimension_numbers = #tpu.dot_dimension_numbers<[2], [1], [1], [2], [0, 0, 0, 1, 1, 2], [0], [0]>} : vector<2x8x8xf32>, vector<2x8x8xf32>, vector<2x8x8xf32> -> vector<2x8x8xf32>
    "tpu.trace_stop"() : () -> ()
    %266 = tpu.concatenate %205, %225, %245, %265 in 2 : vector<2x8x8xf32>, vector<2x8x8xf32>, vector<2x8x8xf32>, vector<2x8x8xf32> -> vector<2x8x32xf32>
    %267 = vector.shape_cast %266 : vector<2x8x32xf32> to vector<16x32xf32>
    %c1_126 = arith.constant 1 : index
    %c0_127 = arith.constant 0 : index
    %c0_128 = arith.constant 0 : index
    %268 = vector.load %arg12[%c1_126, %c0_127, %c0_128] : memref<2x32x32xf32, #tpu.memory_space<vmem>>, vector<1x32x32xf32>
    %269 = vector.shape_cast %268 : vector<1x32x32xf32> to vector<32x32xf32>
    %cst_129 = arith.constant dense<0.000000e+00> : vector<16x32xf32>
    %270 = tpu.matmul %267, %269, %cst_129 {dimension_numbers = #tpu.dot_dimension_numbers<[1], [0], [0], [1], [0, 0, 1, 1], [], []>} : vector<16x32xf32>, vector<32x32xf32>, vector<16x32xf32> -> vector<16x32xf32>
    %271 = arith.addf %159, %270 : vector<16x32xf32>
    %c1_130 = arith.constant 1 : index
    %c0_131 = arith.constant 0 : index
    %c0_132 = arith.constant 0 : index
    %272 = vector.load %arg13[%c1_130, %c0_131, %c0_132] : memref<2x32x32xf32, #tpu.memory_space<vmem>>, vector<1x32x32xf32>
    %273 = vector.shape_cast %272 : vector<1x32x32xf32> to vector<32x32xf32>
    %cst_133 = arith.constant dense<0.000000e+00> : vector<2x32xf32>
    %274 = tpu.matmul %13, %273, %cst_133 {dimension_numbers = #tpu.dot_dimension_numbers<[1], [0], [0], [1], [0, 0, 1, 1], [], []>} : vector<2x32xf32>, vector<32x32xf32>, vector<2x32xf32> -> vector<2x32xf32>
    %c1_134 = arith.constant 1 : index
    %c0_135 = arith.constant 0 : index
    %c0_136 = arith.constant 0 : index
    %275 = vector.load %arg14[%c1_134, %c0_135, %c0_136] : memref<2x32x32xf32, #tpu.memory_space<vmem>>, vector<1x32x32xf32>
    %276 = vector.shape_cast %275 : vector<1x32x32xf32> to vector<32x32xf32>
    %cst_137 = arith.constant dense<0.000000e+00> : vector<2x32xf32>
    %277 = tpu.matmul %274, %276, %cst_137 {dimension_numbers = #tpu.dot_dimension_numbers<[1], [0], [0], [1], [0, 0, 1, 1], [], []>} : vector<2x32xf32>, vector<32x32xf32>, vector<2x32xf32> -> vector<2x32xf32>
    %278 = vector.shape_cast %271 : vector<16x32xf32> to vector<2x8x32xf32>
    %279 = vector.shape_cast %277 : vector<2x32xf32> to vector<2x1x32xf32>
    %280 = vector.broadcast %279 : vector<2x1x32xf32> to vector<2x8x32xf32>
    %281 = arith.addf %278, %280 : vector<2x8x32xf32>
    %282 = vector.shape_cast %281 : vector<2x8x32xf32> to vector<16x32xf32>
    %c1_138 = arith.constant 1 : index
    %c0_139 = arith.constant 0 : index
    %c0_140 = arith.constant 0 : index
    %283 = vector.load %arg15[%c1_138, %c0_139, %c0_140] : memref<2x1x32xf32, #tpu.memory_space<vmem>>, vector<1x1x32xf32>
    %284 = vector.shape_cast %283 : vector<1x1x32xf32> to vector<1x32xf32>
    %285 = arith.mulf %282, %282 : vector<16x32xf32>
    %cst_141 = arith.constant dense<0.000000e+00> : vector<16xf32>
    %286 = vector.multi_reduction <add>, %285, %cst_141 [1] : vector<16x32xf32> to vector<16xf32>
    %287 = vector.shape_cast %286 : vector<16xf32> to vector<16x1xf32>
    %cst_142 = arith.constant 3.200000e+01 : f32
    %288 = vector.broadcast %cst_142 : f32 to vector<16x1xf32>
    %289 = arith.divf %287, %288 : vector<16x1xf32>
    %cst_143 = arith.constant 9.99999997E-7 : f32
    %290 = vector.broadcast %cst_143 : f32 to vector<16x1xf32>
    %291 = arith.addf %289, %290 : vector<16x1xf32>
    %292 = math.rsqrt %291 : vector<16x1xf32>
    %293 = vector.broadcast %292 : vector<16x1xf32> to vector<16x32xf32>
    %294 = arith.mulf %282, %293 : vector<16x32xf32>
    %295 = vector.broadcast %284 : vector<1x32xf32> to vector<16x32xf32>
    %296 = arith.mulf %294, %295 : vector<16x32xf32>
    %c1_144 = arith.constant 1 : index
    %c0_145 = arith.constant 0 : index
    %c0_146 = arith.constant 0 : index
    %297 = vector.load %arg16[%c1_144, %c0_145, %c0_146] : memref<2x32x64xf32, #tpu.memory_space<vmem>>, vector<1x32x64xf32>
    %298 = vector.shape_cast %297 : vector<1x32x64xf32> to vector<32x64xf32>
    %cst_147 = arith.constant dense<0.000000e+00> : vector<16x64xf32>
    %299 = tpu.matmul %296, %298, %cst_147 {dimension_numbers = #tpu.dot_dimension_numbers<[1], [0], [0], [1], [0, 0, 1, 1], [], []>} : vector<16x32xf32>, vector<32x64xf32>, vector<16x64xf32> -> vector<16x64xf32>
    %cst_148 = arith.constant 0.000000e+00 : f32
    %300 = vector.broadcast %cst_148 : f32 to vector<16x64xf32>
    %301 = arith.maximumf %299, %300 : vector<16x64xf32>
    %c1_149 = arith.constant 1 : index
    %c0_150 = arith.constant 0 : index
    %c0_151 = arith.constant 0 : index
    %302 = vector.load %arg17[%c1_149, %c0_150, %c0_151] : memref<2x64x32xf32, #tpu.memory_space<vmem>>, vector<1x64x32xf32>
    %303 = vector.shape_cast %302 : vector<1x64x32xf32> to vector<64x32xf32>
    %cst_152 = arith.constant dense<0.000000e+00> : vector<16x32xf32>
    %304 = tpu.matmul %301, %303, %cst_152 {dimension_numbers = #tpu.dot_dimension_numbers<[1], [0], [0], [1], [0, 0, 1, 1], [], []>} : vector<16x64xf32>, vector<64x32xf32>, vector<16x32xf32> -> vector<16x32xf32>
    %305 = arith.addf %282, %304 : vector<16x32xf32>
    %c0_153 = arith.constant 0 : index
    %c0_154 = arith.constant 0 : index
    %306 = vector.load %arg18[%c0_153, %c0_154] : memref<1x32xf32, #tpu.memory_space<vmem>>, vector<1x32xf32>
    %307 = arith.mulf %305, %305 : vector<16x32xf32>
    %cst_155 = arith.constant dense<0.000000e+00> : vector<16xf32>
    %308 = vector.multi_reduction <add>, %307, %cst_155 [1] : vector<16x32xf32> to vector<16xf32>
    %309 = vector.shape_cast %308 : vector<16xf32> to vector<16x1xf32>
    %cst_156 = arith.constant 3.200000e+01 : f32
    %310 = vector.broadcast %cst_156 : f32 to vector<16x1xf32>
    %311 = arith.divf %309, %310 : vector<16x1xf32>
    %cst_157 = arith.constant 9.99999997E-7 : f32
    %312 = vector.broadcast %cst_157 : f32 to vector<16x1xf32>
    %313 = arith.addf %311, %312 : vector<16x1xf32>
    %314 = math.rsqrt %313 : vector<16x1xf32>
    %315 = vector.broadcast %314 : vector<16x1xf32> to vector<16x32xf32>
    %316 = arith.mulf %305, %315 : vector<16x32xf32>
    %317 = vector.broadcast %306 : vector<1x32xf32> to vector<16x32xf32>
    %318 = arith.mulf %316, %317 : vector<16x32xf32>
    %cst_158 = arith.constant 0.176776692 : f32
    %319 = vector.broadcast %cst_158 : f32 to vector<16x32xf32>
    %320 = arith.mulf %318, %319 : vector<16x32xf32>
    %cst_159 = arith.constant dense<0.000000e+00> : vector<16x16xf32>
    %321 = tpu.matmul %320, %6, %cst_159 {dimension_numbers = #tpu.dot_dimension_numbers<[1], [1], [0], [0], [0, 0, 1, 0], [], []>} : vector<16x32xf32>, vector<16x32xf32>, vector<16x16xf32> -> vector<16x16xf32>
    %c0_160 = arith.constant 0 : index
    %c0_161 = arith.constant 0 : index
    %322 = vector.load %arg2[%c0_160, %c0_161] : memref<16x1xi32, #tpu.memory_space<vmem>>, vector<16x1xi32>
    %cst_162 = arith.constant dense<0xFF800000> : vector<16xf32>
    %323 = vector.multi_reduction <maximumf>, %321, %cst_162 [1] : vector<16x16xf32> to vector<16xf32>
    %324 = vector.shape_cast %323 : vector<16xf32> to vector<16x1xf32>
    %325 = vector.broadcast %324 : vector<16x1xf32> to vector<16x16xf32>
    %326 = arith.subf %321, %325 : vector<16x16xf32>
    %327 = math.exp %326 : vector<16x16xf32>
    %cst_163 = arith.constant dense<0.000000e+00> : vector<16xf32>
    %328 = vector.multi_reduction <add>, %327, %cst_163 [1] : vector<16x16xf32> to vector<16xf32>
    %329 = vector.shape_cast %328 : vector<16xf32> to vector<16x1xf32>
    %330 = math.log %329 : vector<16x1xf32>
    %331 = arith.addf %330, %324 : vector<16x1xf32>
    %332 = vector.broadcast %322 : vector<16x1xi32> to vector<16x16xi32>
    %333 = arith.cmpi eq, %1, %332 : vector<16x16xi32>
    %334 = arith.extui %333 : vector<16x16xi1> to vector<16x16xi32>
    %335 = arith.sitofp %334 : vector<16x16xi32> to vector<16x16xf32>
    %336 = arith.mulf %321, %335 : vector<16x16xf32>
    %cst_164 = arith.constant dense<0.000000e+00> : vector<16xf32>
    %337 = vector.multi_reduction <add>, %336, %cst_164 [1] : vector<16x16xf32> to vector<16xf32>
    %338 = vector.shape_cast %337 : vector<16xf32> to vector<16x1xf32>
    %c-100_i32 = arith.constant -100 : i32
    %339 = vector.broadcast %c-100_i32 : i32 to vector<16x1xi32>
    %340 = arith.cmpi ne, %322, %339 : vector<16x1xi32>
    %341 = arith.extui %340 : vector<16x1xi1> to vector<16x1xi32>
    %342 = arith.sitofp %341 : vector<16x1xi32> to vector<16x1xf32>
    %343 = arith.subf %331, %338 : vector<16x1xf32>
    %344 = arith.mulf %343, %342 : vector<16x1xf32>
    %345 = vector.shape_cast %344 : vector<16x1xf32> to vector<1x16x1xf32>
    %cst_165 = arith.constant dense<0.000000e+00> : vector<1xf32>
    %346 = vector.multi_reduction <add>, %345, %cst_165 [1, 2] : vector<1x16x1xf32> to vector<1xf32>
    %347 = vector.shape_cast %346 : vector<1xf32> to vector<1x1x1xf32>
    %348 = vector.extract %347[0, 0, 0] : f32 from vector<1x1x1xf32>
    %349 = vector.broadcast %348 : f32 to vector<1x1xf32>
    %350 = vector.shape_cast %342 : vector<16x1xf32> to vector<1x16x1xf32>
    %cst_166 = arith.constant dense<0.000000e+00> : vector<1xf32>
    %351 = vector.multi_reduction <add>, %350, %cst_166 [1, 2] : vector<1x16x1xf32> to vector<1xf32>
    %352 = vector.shape_cast %351 : vector<1xf32> to vector<1x1x1xf32>
    %353 = vector.extract %352[0, 0, 0] : f32 from vector<1x1x1xf32>
    %354 = vector.broadcast %353 : f32 to vector<1x1xf32>
    %355 = arith.divf %349, %354 : vector<1x1xf32>
    %c0_167 = arith.constant 0 : index
    %c0_168 = arith.constant 0 : index
    %356 = vector.load %arg19[%c0_167, %c0_168] : memref<1x1xf32, #tpu.memory_space<vmem>>, vector<1x1xf32>
    tpu.vector_store %arg19[%c0_167, %c0_168], %355 {strides = array<i32>} : memref<1x1xf32, #tpu.memory_space<vmem>>, vector<1x1xf32>,
    return
  }
  func.func @transform_0(%arg0: i32) -> (i32, i32) {
    %c0_i32 = arith.constant 0 : i32
    %c0_i32_0 = arith.constant 0 : i32
    %c0_i32_1 = arith.constant 0 : i32
    return %c0_i32, %c0_i32_0 : i32, i32
  }
  func.func @transform_1(%arg0: i32) -> (i32, i32) {
    %c0_i32 = arith.constant 0 : i32
    %c0_i32_0 = arith.constant 0 : i32
    %c0_i32_1 = arith.constant 0 : i32
    return %c0_i32, %c0_i32_0 : i32, i32
  }
  func.func @transform_2(%arg0: i32) -> (i32, i32) {
    %c0_i32 = arith.constant 0 : i32
    %c0_i32_0 = arith.constant 0 : i32
    %c0_i32_1 = arith.constant 0 : i32
    return %c0_i32, %c0_i32_0 : i32, i32
  }
  func.func @transform_3(%arg0: i32) -> (i32, i32) {
    %c0_i32 = arith.constant 0 : i32
    %c0_i32_0 = arith.constant 0 : i32
    %c0_i32_1 = arith.constant 0 : i32
    return %c0_i32, %c0_i32_0 : i32, i32
  }
  func.func @transform_4(%arg0: i32) -> (i32, i32) {
    %c0_i32 = arith.constant 0 : i32
    %c0_i32_0 = arith.constant 0 : i32
    %c0_i32_1 = arith.constant 0 : i32
    return %c0_i32, %c0_i32_0 : i32, i32
  }
  func.func @transform_5(%arg0: i32) -> (i32, i32) {
    %c0_i32 = arith.constant 0 : i32
    %c0_i32_0 = arith.constant 0 : i32
    %c0_i32_1 = arith.constant 0 : i32
    return %c0_i32, %c0_i32_0 : i32, i32
  }
  func.func @transform_6(%arg0: i32) -> (i32, i32, i32) {
    %c0_i32 = arith.constant 0 : i32
    %c0_i32_0 = arith.constant 0 : i32
    %c0_i32_1 = arith.constant 0 : i32
    %c0_i32_2 = arith.constant 0 : i32
    return %c0_i32, %c0_i32_0, %c0_i32_1 : i32, i32, i32
  }
  func.func @transform_7(%arg0: i32) -> (i32, i32, i32) {
    %c0_i32 = arith.constant 0 : i32
    %c0_i32_0 = arith.constant 0 : i32
    %c0_i32_1 = arith.constant 0 : i32
    %c0_i32_2 = arith.constant 0 : i32
    return %c0_i32, %c0_i32_0, %c0_i32_1 : i32, i32, i32
  }
  func.func @transform_8(%arg0: i32) -> (i32, i32, i32) {
    %c0_i32 = arith.constant 0 : i32
    %c0_i32_0 = arith.constant 0 : i32
    %c0_i32_1 = arith.constant 0 : i32
    %c0_i32_2 = arith.constant 0 : i32
    return %c0_i32, %c0_i32_0, %c0_i32_1 : i32, i32, i32
  }
  func.func @transform_9(%arg0: i32) -> (i32, i32, i32) {
    %c0_i32 = arith.constant 0 : i32
    %c0_i32_0 = arith.constant 0 : i32
    %c0_i32_1 = arith.constant 0 : i32
    %c0_i32_2 = arith.constant 0 : i32
    return %c0_i32, %c0_i32_0, %c0_i32_1 : i32, i32, i32
  }
  func.func @transform_10(%arg0: i32) -> (i32, i32, i32) {
    %c0_i32 = arith.constant 0 : i32
    %c0_i32_0 = arith.constant 0 : i32
    %c0_i32_1 = arith.constant 0 : i32
    %c0_i32_2 = arith.constant 0 : i32
    return %c0_i32, %c0_i32_0, %c0_i32_1 : i32, i32, i32
  }
  func.func @transform_11(%arg0: i32) -> (i32, i32, i32) {
    %c0_i32 = arith.constant 0 : i32
    %c0_i32_0 = arith.constant 0 : i32
    %c0_i32_1 = arith.constant 0 : i32
    %c0_i32_2 = arith.constant 0 : i32
    return %c0_i32, %c0_i32_0, %c0_i32_1 : i32, i32, i32
  }
  func.func @transform_12(%arg0: i32) -> (i32, i32, i32) {
    %c0_i32 = arith.constant 0 : i32
    %c0_i32_0 = arith.constant 0 : i32
    %c0_i32_1 = arith.constant 0 : i32
    %c0_i32_2 = arith.constant 0 : i32
    return %c0_i32, %c0_i32_0, %c0_i32_1 : i32, i32, i32
  }
  func.func @transform_13(%arg0: i32) -> (i32, i32, i32) {
    %c0_i32 = arith.constant 0 : i32
    %c0_i32_0 = arith.constant 0 : i32
    %c0_i32_1 = arith.constant 0 : i32
    %c0_i32_2 = arith.constant 0 : i32
    return %c0_i32, %c0_i32_0, %c0_i32_1 : i32, i32, i32
  }
  func.func @transform_14(%arg0: i32) -> (i32, i32, i32) {
    %c0_i32 = arith.constant 0 : i32
    %c0_i32_0 = arith.constant 0 : i32
    %c0_i32_1 = arith.constant 0 : i32
    %c0_i32_2 = arith.constant 0 : i32
    return %c0_i32, %c0_i32_0, %c0_i32_1 : i32, i32, i32
  }
  func.func @transform_15(%arg0: i32) -> (i32, i32, i32) {
    %c0_i32 = arith.constant 0 : i32
    %c0_i32_0 = arith.constant 0 : i32
    %c0_i32_1 = arith.constant 0 : i32
    %c0_i32_2 = arith.constant 0 : i32
    return %c0_i32, %c0_i32_0, %c0_i32_1 : i32, i32, i32
  }
  func.func @transform_16(%arg0: i32) -> (i32, i32, i32) {
    %c0_i32 = arith.constant 0 : i32
    %c0_i32_0 = arith.constant 0 : i32
    %c0_i32_1 = arith.constant 0 : i32
    %c0_i32_2 = arith.constant 0 : i32
    return %c0_i32, %c0_i32_0, %c0_i32_1 : i32, i32, i32
  }
  func.func @transform_17(%arg0: i32) -> (i32, i32) {
    %c0_i32 = arith.constant 0 : i32
    %c0_i32_0 = arith.constant 0 : i32
    %c0_i32_1 = arith.constant 0 : i32
    return %c0_i32, %c0_i32_0 : i32, i32
  }
  func.func @transform_18(%arg0: i32) -> (i32, i32) {
    %c0_i32 = arith.constant 0 : i32
    %c0_i32_0 = arith.constant 0 : i32
    %c0_i32_1 = arith.constant 0 : i32
    return %c0_i32, %c0_i32_0 : i32, i32
  }
}

</mosaic_0001>

<bundles_post_ra>
// kernel: t5_decoder_forward.1
= control target key start
LH: loop header
LB: loop body
LE: loop exit
PB: predicated region body
PF: predicated region fallthrough
CT: control target
= control target key end

     0   :  { %s6538_s0 = inlined_call_operand.vmem [shape: s32[16,1], index: 0, kind: input, shape index: {}]   ;;  %s6539_s1 = inlined_call_operand.vmem [shape: s32[16,1], index: 1, kind: input, shape index: {}]   ;;  %s6540_s2 = inlined_call_operand.vmem [shape: f32[2,24], index: 2, kind: input, shape index: {}]   ;;  %s6541_s3 = inlined_call_operand.vmem [shape: f32[16,32], index: 3, kind: input, shape index: {}]   ;;  %s6542_s4 = inlined_call_operand.vmem [shape: f32[24,32], index: 4, kind: input, shape index: {}]   ;;  %s6543_s5 = inlined_call_operand.vmem [shape: f32[1,32], index: 5, kind: input, shape index: {}]   ;;  %s6544_s6 = inlined_call_operand.vmem [shape: f32[4,8,8], index: 6, kind: input, shape index: {}]   ;;  %s6545_s7 = inlined_call_operand.vmem [shape: f32[2,1,32], index: 7, kind: input, shape index: {}]   ;;  %s6546_s8 = inlined_call_operand.vmem [shape: f32[2,32,32], index: 8, kind: input, shape index: {}]   ;;  %s6547_s9 = inlined_call_operand.vmem [shape: f32[2,32,32], index: 9, kind: input, shape index: {}]   ;;  %s6548_s10 = inlined_call_operand.vmem [shape: f32[2,32,32], index: 10, kind: input, shape index: {}]   ;;  %s6549_s11 = inlined_call_operand.vmem [shape: f32[2,32,32], index: 11, kind: input, shape index: {}]   ;;  %s6550_s12 = inlined_call_operand.vmem [shape: f32[2,32,32], index: 12, kind: input, shape index: {}]   ;;  %s6551_s13 = inlined_call_operand.vmem [shape: f32[2,32,32], index: 13, kind: input, shape index: {}]   ;;  %s6552_s14 = inlined_call_operand.vmem [shape: f32[2,1,32], index: 14, kind: input, shape index: {}]   ;;  %s6553_s15 = inlined_call_operand.vmem [shape: f32[2,32,64], index: 15, kind: input, shape index: {}]   ;;  %s6554_s16 = inlined_call_operand.vmem [shape: f32[2,64,32], index: 16, kind: input, shape index: {}]   ;;  %s6555_s17 = inlined_call_operand.vmem [shape: f32[1,32], index: 17, kind: input, shape index: {}]   ;;  %s6556_s18 = inlined_call_operand.hbm [shape: f32[1,1], index: 18, kind: output, shape index: {}]  }
   0x1   :  { %6559 = sst [smem:[#allocation5_spill]] %s6538_s0 }
   0x2   :  { %6560 = sst [smem:[#allocation6_spill]] %s6539_s1 }
   0x3   :  { %6561 = sst [smem:[#allocation7_spill]] %s6540_s2 }
   0x4   :  { %s6562_s29 = sld [smem:[#allocation5_spill]]  ;;  %v5635_v1 = vmov 0   ;;  %v76_v2 = vld [vmem:[%s6541_s3] sm:$0xff]  ;;  %v77_v3 = vld [vmem:[%s6541_s3 + $0x8] sm:$0xff] }
   0x5   :  { %5515 = vset.pattern.permute.xlu0 %v5635_v1  ;;  %5516 = vset.pattern.permute.xlu1 %v5635_v1 }
   0xa   :  { %v60_v0 = vld [vmem:[%s6562_s29] sm:$0xff] }
   0xb   :  { %23 = vsyncpa [#allocation3], 0  ;;  %65 = vperm.xlu0 %5515, %v60_v0   ;;  %v5751_v4 = vpack.c.bf16 %v77_v3, %v76_v2  ;;  %v61_v5 = vld [vmem:[%s6562_s29 + $0x8] sm:$0xff]  ;;  %v62_v6 = vlaneseq  ;;  %vm78_vm0 = vcmask 130048   ;;  %v5636_v9 = vmov 0.0   ;;  %v161_v19 = vld [vmem:[%s6542_s4] sm:$0xff] }
   0xc   :  { %vm248_vm3 = vcmask 261120   ;;  %v162_v20 = vld [vmem:[%s6542_s4 + $0x8] sm:$0xff]  ;;  %v272_v22 = vld [vmem:[%s6546_s8] sm:$0xff]  ;;  %v5637_v24 = vmov 0.0|0.0   ;;  %vm5638_vm4 = vmmov 0   ;;  %v274_v28 = vld [vmem:[%s6546_s8 + $0x10] sm:$0xff] }
   0xd   :  { %5351 = vmatprep.subr.bf16.mxu1 %v5751_v4  ;;  %v5759_v7 = vand.u32 127, %v62_v6  ;;  %v5355_v21 = vpack.c.bf16 %v162_v20, %v161_v19  ;;  %v273_v23 = vld [vmem:[%s6546_s8 + $0x8] sm:$0xff]  ;;  %v357_v26 = vld [vmem:[%s6547_s9] sm:$0xff]  ;;  %v275_v29 = vld [vmem:[%s6546_s8 + $0x18] sm:$0xff]  ;;  %s6563_s24 = sld [smem:[#allocation7_spill]]  ;;  %vm171_vm5 = vcmask 195584  }
   0xe   :  { %5353 = vmatpush3.bf16.msra.mxu1 %v5751_v4  ;;  %v5357_v25 = vpack.c.bf16 %v273_v23, %v272_v22  ;;  %v358_v27 = vld [vmem:[%s6547_s9 + $0x8] sm:$0xff]  ;;  %v163_v30 = vld [vmem:[%s6542_s4 + $0x10] sm:$0xff]  ;;  %v5361_v32 = vpack.c.bf16 %v275_v29, %v274_v28  ;;  %v360_v35 = vld [vmem:[%s6547_s9 + $0x18] sm:$0xff]  ;;  %vm516_vm6 = vcmask 64512   ;;  %s5640_s4 = smov 112   ;;  %s5641_s29 = smov 104  }
   0xf   :  { %68 = vperm.xlu0 %5515, %v61_v5   ;;  %5354 = vmatprep.subr.bf16.mxu1 %v5637_v24  ;;  %v5365_v31 = vpack.c.bf16 %v358_v27, %v357_v26  ;;  %v359_v34 = vld [vmem:[%s6547_s9 + $0x10] sm:$0xff]  ;;  %v436_v37 = vld [vmem:[%s6548_s10] sm:$0xff]  ;;  %v437_v38 = vld [vmem:[%s6548_s10 + $0x8] sm:$0xff]  ;;  %s5643_s19 = smov 16   ;;  %s5644_s22 = smov 24   ;;  %vm2261_vm7 = vcmask 523264  }
  0x10   :  { %5358 = vmatprep.subr.bf16.mxu0 %v5357_v25  ;;  %v5369_v36 = vpack.c.bf16 %v360_v35, %v359_v34  ;;  %v5373_v39 = vpack.c.bf16 %v437_v38, %v436_v37  ;;  %v4666_v47 = vld [vmem:[%s6545_s7] ss:$0 sm:$0xff]  ;;  %v438_v51 = vld [vmem:[%s6548_s10 + $0x10] sm:$0xff]  ;;  %v439_v52 = vld [vmem:[%s6548_s10 + $0x18] sm:$0xff]  ;;  %vm4615_vm13 = vcmask 7168   ;;  %vm4644_vm14 = vcmask 0  }
  0x11   :  { %5360 = vmatpush3.bf16.msra.mxu0 %v5357_v25  ;;  %v5377_v55 = vpack.c.bf16 %v439_v52, %v438_v51  ;;  %v5882_v0 = vld [vmem:[%s6544_s6] sm:$0xff]  ;;  %v5919_v38 = vld [vmem:[%s6544_s6 + $0x8] sm:$0xff]  ;;  %vm5494_vm8 = vmpackc.low %vm248_vm3, %vm248_vm3 }
  0x12   :  { %5362 = vmatprep.subr.bf16.mxu0 %v5361_v32 }
  0x13   :  { %v160_v33 = vld [vmem:[%s6563_s24] sm:$0x3]  ;;  %s5639_s24 = smov 120  }
  0x15   :  { %5364 = vmatpush3.bf16.msra.mxu0 %v5361_v32 }
  0x16   :  { %5374 = vmatprep.subr.bf16.mxu0 %v5373_v39 }
  0x8a   :  { %v66_v8 = vpop.permute.xlu0 %65 }
  0x8b   :  { %vm70_vm1 = vcmp.eq.s32.totalorder %v5759_v7, %v66_v8 }
  0x8c   :  { %v4660_v10 = vsel %vm70_vm1, 1.0, %v5636_v9 }
  0x8d   :  { %4979 = vmatprep.mubr.msk.f32.mxu1 %vm78_vm0, %v4660_v10 }
  0x8e   :  { %v69_v11 = vpop.permute.xlu0 %68 }
  0x8f   :  { %vm71_vm2 = vcmp.eq.s32.totalorder %v5759_v7, %v69_v11 }
  0x90   :  { %v4661_v12 = vsel %vm71_vm2, 1.0, %v5636_v9 }
  0x91   :  { %4980 = vmatmul.mubr.msk.f32.vlgmr.msra.gmra.mrb[0].mxu1 %vm78_vm0, %v4661_v12 }
  0x92   :  { %4988 = vmatprep.mubr.msk.f32.mxu1 %vm5638_vm4, %v5636_v9  ;;  %5356 = vmatpush3.bf16.msra.mxu1 %v5355_v21 }
  0x93   :  { %4986 = vmatprep.subr.mxu1 %v5636_v9 }
  0x96   :  { %4987 = vmatpush3.msra.mxu1 %v163_v30 }
  0x97   :  { %4989 = vmatmul.mubr.msk.f32.vlgmr.msra.gmra.mrb[2].mxu1 %vm171_vm5, %v160_v33  ;;  %5366 = vmatprep.subr.bf16.mxu1 %v5365_v31 }
  0x98   :  { %5368 = vmatpush3.bf16.msra.mxu1 %v5365_v31 }
  0x99   :  { %5370 = vmatprep.subr.bf16.mxu1 %v5369_v36 }
  0x9c   :  { %5372 = vmatpush3.bf16.msra.mxu1 %v5369_v36 }
  0x9d   :  { %5024 = vmatprep.subr.mxu1 %v5636_v9 }
 0x164   :  { %v5767_v13 = vpop.f32.mrb[0].mxu1 }
 0x165   :  { %v5769_v14 = vpop.f32.mrb[1].mxu1  ;;  %v247_v17 = vmul.f32 %v5767_v13, %v5767_v13 }
 0x166   :  { %v246_v15 = vmul.f32 %v5769_v14, %v5769_v14 }
 0x167   :  { %v252_v18 = vsel %vm248_vm3, %v247_v17, 0.0 }
 0x168   :  { %v249_v16 = vsel %vm248_vm3, %v246_v15, 0.0 }
 0x169   :  { %250 = vadd.xlane.f32.xlu1 %v249_v16 }
 0x16a   :  { %v5847_v56 = vpop.f32.mrb[2].mxu1 }
 0x16b   :  { %v4990_v57 = vpop.f32.mrb[3].mxu1 }
 0x16d   :  { %253 = vadd.xlane.f32.xlu1 %v252_v18 }
 0x1f6   :  { %v251_v40 = vpop.xlane.xlu1 %250 }
 0x1f7   :  { %v256_v41 = vmul.f32 0.03125, %v251_v40 }
 0x1f9   :  { %v258_v42 = vadd.f32 1e-06, %v256_v41 }
 0x1fa   :  { %v254_v43 = vpop.xlane.xlu1 %253 }
 0x1fb   :  { %5517 = vrsqrt.f32 %v258_v42  ;;  %v257_v44 = vmul.f32 0.03125, %v254_v43 }
 0x1fd   :  { %v259_v45 = vadd.f32 1e-06, %v257_v44 }
 0x1ff   :  { %5519 = vrsqrt.f32 %v259_v45 }
 0x205   :  { %v5518_v46 = vpop.eup %5517 }
 0x206   :  { %v262_v48 = vmul.f32 %v5518_v46, %v5769_v14 }
 0x208   :  { %v270_v49 = vmul.f32 %v4666_v47, %v262_v48 }
 0x209   :  { %v5520_v50 = vpop.eup %5519 }
 0x20a   :  { %v263_v53 = vmul.f32 %v5520_v50, %v5767_v13  ;;  %4999 = vmatprep.mubr.msk.f32.mxu0 %vm248_vm3, %v270_v49  ;;  %5010 = vmatprep.mubr.msk.f32.mxu1 %vm248_vm3, %v270_v49 }
 0x20c   :  { %v271_v54 = vmul.f32 %v4666_v47, %v263_v53 }
 0x20e   :  { %5000 = vmatmul.mubr.msk.f32.vlgmr.msra.gmra.mrb[0].mxu0 %vm248_vm3, %v271_v54  ;;  %5011 = vmatmul.mubr.msk.f32.vlgmr.msra.gmra.mrb[4].mxu1 %vm248_vm3, %v271_v54 }
 0x20f   :  { %5376 = vmatpush3.bf16.msra.mxu0 %v5373_v39  ;;  %5021 = vmatprep.mubr.msk.f32.mxu0 %vm248_vm3, %v270_v49 }
 0x210   :  { %5378 = vmatprep.subr.bf16.mxu0 %v5377_v55  ;;  %5026 = vmatprep.mubr.msk.f32.mxu1 %vm5638_vm4, %v5636_v9 }
 0x213   :  { %5380 = vmatpush3.bf16.msra.mxu0 %v5377_v55 }
 0x214   :  { %5034 = vmatprep.subr.mxu0 %v5636_v9 }
 0x216   :  { %5022 = vmatmul.mubr.msk.f32.vlgmr.msra.gmra.mrb[2].mxu0 %vm248_vm3, %v271_v54 }
 0x217   :  { %5036 = vmatprep.mubr.msk.f32.mxu0 %vm5638_vm4, %v5636_v9 }
 0x2e1   :  { %v5849_v58 = vpop.f32.mrb[0].mxu0  ;;  %v5851_v59 = vpop.f32.mrb[4].mxu1 }
 0x2e2   :  { %v5853_v60 = vpop.f32.mrb[1].mxu0  ;;  %v5855_v61 = vpop.f32.mrb[5].mxu1 }
 0x2e3   :  { %5025 = vmatpush3.xpose.msk.msra.mxu1 %vm516_vm6, %v5855_v61 }
 0x2e4   :  { %5029 = vmatprep.subr.mxu1 %v5636_v9 }
 0x2e6   :  { %5027 = vmatmul.mubr.msk.f32.vlgmr.msra.gmra.mrb[6].mxu1 %vm516_vm6, %v5853_v60 }
 0x2e7   :  { %5030 = vmatpush3.xpose.msk.msra.mxu1 %vm516_vm6, %v5851_v59  ;;  %5031 = vmatprep.mubr.msk.f32.mxu1 %vm5638_vm4, %v5636_v9 }
 0x2e8   :  { %5039 = vmatprep.subr.mxu1 %v5636_v9 }
 0x2e9   :  { %v5867_v62 = vpop.f32.mrb[2].mxu0 }
 0x2ea   :  { %v5869_v63 = vpop.f32.mrb[3].mxu0  ;;  %5032 = vmatmul.mubr.msk.f32.vlgmr.msra.gmra.mrb[8].mxu1 %vm516_vm6, %v5849_v58 }
 0x2eb   :  { %5035 = vmatpush3.msra.mxu0 %v5869_v63  ;;  %5040 = vmatpush3.msra.mxu1 %v5867_v62 }
 0x2ec   :  { %5044 = vmatprep.subr.mxu0 %v5636_v9  ;;  %5041 = vmatprep.mubr.msk.f32.mxu1 %vm5638_vm4, %v5636_v9 }
 0x2ed   :  { %5049 = vmatprep.subr.mxu1 %v5636_v9 }
 0x3b9   :  { %v589_v1 = vpop.f32.mrb[6].mxu1 }
 0x3ba   :  { %v590_v2 = vadd.f32 %v589_v1, %v5882_v0  ;;  %v5028_v3 = vpop.f32.mrb[7].mxu1 }
 0x3bc   :  { %v669_v5 = vsel %vm516_vm6, %v590_v2, -inf }
 0x3bd   :  { %670 = vmax.xlane.f32.xlu0 %v669_v5  ;;  %v665_v8 = vpop.f32.mrb[8].mxu1 }
 0x3be   :  { %v666_v10 = vadd.f32 %v665_v8, %v5882_v0  ;;  %v5033_v11 = vpop.f32.mrb[9].mxu1 }
 0x3c0   :  { %v672_v12 = vsel %vm516_vm6, %v666_v10, -inf }
 0x3c1   :  { %673 = vmax.xlane.f32.xlu1 %v672_v12 }
 0x3d2   :  { %841 = vrot.lane.b32.xlu1 %v5855_v61, %s5639_s24 }
 0x3d3   :  { %839 = vrot.lane.b32.xlu0 %v5853_v60, %s5639_s24 }
 0x3d6   :  { %919 = vrot.lane.b32.xlu1 %v5851_v59, %s5639_s24 }
 0x44a   :  { %v671_v15 = vpop.xlane.xlu0 %670 }
 0x44b   :  { %v675_v16 = vsub.f32 %v590_v2, %v671_v15 }
 0x44d   :  { %v677_v17 = vmul.f32 1.442695, %v675_v16 }
 0x44e   :  { %v674_v18 = vpop.xlane.xlu1 %673  ;;  %v840_v34 = vpop.permute.xlu0 %839 }
 0x44f   :  { %5521 = vpow2.f32 %v677_v17  ;;  %v676_v19 = vsub.f32 %v666_v10, %v674_v18 }
 0x451   :  { %v679_v20 = vmul.f32 1.442695, %v676_v19 }
 0x452   :  { %v842_v26 = vpop.permute.xlu1 %841 }
 0x453   :  { %5523 = vpow2.f32 %v679_v20 }
 0x456   :  { %v920_v27 = vpop.permute.xlu1 %919 }
 0x459   :  { %v5522_v21 = vpop.eup %5521 }
 0x45a   :  { %v681_v22 = vsel %vm516_vm6, %v5522_v21, 0.0 }
 0x45b   :  { %682 = vadd.xlane.f32.xlu1 %v681_v22 }
 0x45d   :  { %v5524_v23 = vpop.eup %5523 }
 0x45e   :  { %v684_v25 = vsel %vm516_vm6, %v5524_v23, 0.0 }
 0x45f   :  { %685 = vadd.xlane.f32.xlu1 %v684_v25 }
 0x470   :  { %917 = vrot.lane.b32.xlu1 %v5849_v58, %s5639_s24 }
 0x4e8   :  { %v683_v28 = vpop.xlane.xlu1 %682 }
 0x4e9   :  { %5525 = vrcp.f32 %v683_v28 }
 0x4ec   :  { %v686_v29 = vpop.xlane.xlu1 %685 }
 0x4ed   :  { %5527 = vrcp.f32 %v686_v29 }
 0x4f0   :  { %v918_v35 = vpop.permute.xlu1 %917 }
 0x4f3   :  { %v5526_v30 = vpop.eup %5525 }
 0x4f4   :  { %v689_v31 = vmul.f32 %v5526_v30, %v5522_v21 }
 0x4f6   :  { %5037 = vmatmul.mubr.msk.f32.vlgmr.msra.gmra.mrb[4].mxu0 %vm516_vm6, %v689_v31 }
 0x4f7   :  { %v5528_v32 = vpop.eup %5527  ;;  %5045 = vmatpush3.xpose.msk.msra.mxu0 %vm516_vm6, %v842_v26  ;;  %5046 = vmatprep.mubr.msk.f32.mxu0 %vm5638_vm4, %v5636_v9 }
 0x4f8   :  { %v690_v33 = vmul.f32 %v5528_v32, %v5524_v23  ;;  %5054 = vmatprep.subr.mxu0 %v5636_v9  ;;  %v5964_v23 = vld [vmem:[%s6544_s6 + $0x10] sm:$0xff] }
 0x4fa   :  { %5042 = vmatmul.mubr.msk.f32.vlgmr.msra.gmra.mrb[10].mxu1 %vm516_vm6, %v690_v33  ;;  %5047 = vmatmul.mubr.msk.f32.vlgmr.msra.gmra.mrb[6].mxu0 %vm516_vm6, %v840_v34 }
 0x4fb   :  { %5050 = vmatpush3.xpose.msk.msra.mxu1 %vm516_vm6, %v920_v27  ;;  %5051 = vmatprep.mubr.msk.f32.mxu1 %vm5638_vm4, %v5636_v9 }
 0x4fc   :  { %5059 = vmatprep.subr.mxu1 %v5636_v9  ;;  %5056 = vmatprep.mubr.msk.f32.mxu0 %vm5638_vm4, %v5636_v9 }
 0x4fe   :  { %5052 = vmatmul.mubr.msk.f32.vlgmr.msra.gmra.mrb[12].mxu1 %vm516_vm6, %v918_v35 }
 0x4ff   :  { %5061 = vmatprep.mubr.msk.f32.mxu1 %vm5638_vm4, %v5636_v9 }
 0x5c9   :  { %v5914_v36 = vpop.f32.mrb[4].mxu0 }
 0x5ca   :  { %v5038_v37 = vpop.f32.mrb[5].mxu0 }
 0x5cd   :  { %v5921_v39 = vpop.f32.mrb[10].mxu1  ;;  %v913_v40 = vpop.f32.mrb[6].mxu0 }
 0x5ce   :  { %v914_v41 = vadd.f32 %v5919_v38, %v913_v40  ;;  %v5043_v42 = vpop.f32.mrb[11].mxu1  ;;  %v5048_v43 = vpop.f32.mrb[7].mxu0 }
 0x5d0   :  { %v995_v44 = vsel %vm516_vm6, %v914_v41, -inf }
 0x5d1   :  { %996 = vmax.xlane.f32.xlu1 %v995_v44  ;;  %v991_v45 = vpop.f32.mrb[12].mxu1 }
 0x5d2   :  { %v992_v46 = vadd.f32 %v5919_v38, %v991_v45  ;;  %v5053_v47 = vpop.f32.mrb[13].mxu1 }
 0x5d4   :  { %v998_v48 = vsel %vm516_vm6, %v992_v46, -inf }
 0x5d5   :  { %999 = vmax.xlane.f32.xlu0 %v998_v48 }
 0x5e2   :  { %1018 = vrot.lane.b32.xlu1 %v5869_v63, %s5639_s24 }
 0x5e6   :  { %1175 = vrot.lane.b32.xlu1 %v5855_v61, %s5640_s4 }
 0x5ea   :  { %1253 = vrot.lane.b32.xlu1 %v5851_v59, %s5640_s4 }
 0x5eb   :  { %1095 = vrot.lane.b32.xlu0 %v5867_v62, %s5639_s24 }
 0x5ef   :  { %1173 = vrot.lane.b32.xlu0 %v5853_v60, %s5640_s4 }
 0x65e   :  { %v997_v49 = vpop.xlane.xlu1 %996 }
 0x65f   :  { %v1001_v50 = vsub.f32 %v914_v41, %v997_v49 }
 0x661   :  { %v1003_v51 = vmul.f32 1.442695, %v1001_v50 }
 0x662   :  { %v1019_v52 = vpop.permute.xlu1 %1018  ;;  %v1000_v53 = vpop.xlane.xlu0 %999 }
 0x663   :  { %5529 = vpow2.f32 %v1003_v51  ;;  %v1002_v54 = vsub.f32 %v992_v46, %v1000_v53  ;;  %5055 = vmatpush3.msra.mxu0 %v1019_v52 }
 0x664   :  { %5064 = vmatprep.subr.mxu0 %v5636_v9 }
 0x665   :  { %v1005_v55 = vmul.f32 1.442695, %v1002_v54 }
 0x666   :  { %v1096_v57 = vpop.permute.xlu0 %1095  ;;  %v1176_v8 = vpop.permute.xlu1 %1175 }
 0x667   :  { %5531 = vpow2.f32 %v1005_v55  ;;  %5060 = vmatpush3.msra.mxu1 %v1096_v57 }
 0x668   :  { %5069 = vmatprep.subr.mxu1 %v5636_v9 }
 0x66a   :  { %v1254_v10 = vpop.permute.xlu1 %1253  ;;  %v1174_v19 = vpop.permute.xlu0 %1173 }
 0x66d   :  { %v5530_v1 = vpop.eup %5529 }
 0x66e   :  { %v1007_v2 = vsel %vm516_vm6, %v5530_v1, 0.0 }
 0x66f   :  { %1008 = vadd.xlane.f32.xlu1 %v1007_v2  ;;  %v6007_v2 = vld [vmem:[%s6544_s6 + $0x18] sm:$0xff]  ;;  %s5642_s6 = smov 8  }
 0x671   :  { %v5532_v3 = vpop.eup %5531 }
 0x672   :  { %v1010_v5 = vsel %vm516_vm6, %v5532_v3, 0.0 }
 0x673   :  { %1011 = vadd.xlane.f32.xlu1 %v1010_v5 }
 0x684   :  { %1251 = vrot.lane.b32.xlu1 %v5849_v58, %s5640_s4 }
 0x6fc   :  { %v1009_v11 = vpop.xlane.xlu1 %1008 }
 0x6fd   :  { %5533 = vrcp.f32 %v1009_v11 }
 0x700   :  { %v1012_v12 = vpop.xlane.xlu1 %1011 }
 0x701   :  { %5535 = vrcp.f32 %v1012_v12 }
 0x704   :  { %v1252_v20 = vpop.permute.xlu1 %1251 }
 0x707   :  { %v5534_v15 = vpop.eup %5533 }
 0x708   :  { %v1015_v16 = vmul.f32 %v5534_v15, %v5530_v1 }
 0x70a   :  { %5057 = vmatmul.mubr.msk.f32.vlgmr.msra.gmra.mrb[8].mxu0 %vm516_vm6, %v1015_v16 }
 0x70b   :  { %v5536_v17 = vpop.eup %5535  ;;  %5065 = vmatpush3.xpose.msk.msra.mxu0 %vm516_vm6, %v1176_v8  ;;  %5066 = vmatprep.mubr.msk.f32.mxu0 %vm5638_vm4, %v5636_v9 }
 0x70c   :  { %v1016_v18 = vmul.f32 %v5536_v17, %v5532_v3  ;;  %5074 = vmatprep.subr.mxu0 %v5636_v9 }
 0x70e   :  { %5062 = vmatmul.mubr.msk.f32.vlgmr.msra.gmra.mrb[14].mxu1 %vm516_vm6, %v1016_v18  ;;  %5067 = vmatmul.mubr.msk.f32.vlgmr.msra.gmra.mrb[10].mxu0 %vm516_vm6, %v1174_v19 }
 0x70f   :  { %5070 = vmatpush3.xpose.msk.msra.mxu1 %vm516_vm6, %v1254_v10  ;;  %5071 = vmatprep.mubr.msk.f32.mxu1 %vm5638_vm4, %v5636_v9 }
 0x710   :  { %5079 = vmatprep.subr.mxu1 %v5636_v9  ;;  %5076 = vmatprep.mubr.msk.f32.mxu0 %vm5638_vm4, %v5636_v9 }
 0x712   :  { %5072 = vmatmul.mubr.msk.f32.vlgmr.msra.gmra.mrb[16].mxu1 %vm516_vm6, %v1252_v20 }
 0x713   :  { %5081 = vmatprep.mubr.msk.f32.mxu1 %vm5638_vm4, %v5636_v9 }
 0x7dd   :  { %v5959_v21 = vpop.f32.mrb[8].mxu0 }
 0x7de   :  { %v5058_v22 = vpop.f32.mrb[9].mxu0 }
 0x7e1   :  { %v5966_v25 = vpop.f32.mrb[14].mxu1  ;;  %v1247_v26 = vpop.f32.mrb[10].mxu0 }
 0x7e2   :  { %v1248_v27 = vadd.f32 %v5964_v23, %v1247_v26  ;;  %v5063_v28 = vpop.f32.mrb[15].mxu1  ;;  %v5068_v29 = vpop.f32.mrb[11].mxu0 }
 0x7e4   :  { %v1329_v30 = vsel %vm516_vm6, %v1248_v27, -inf }
 0x7e5   :  { %1330 = vmax.xlane.f32.xlu0 %v1329_v30  ;;  %v1325_v31 = vpop.f32.mrb[16].mxu1 }
 0x7e6   :  { %v1326_v32 = vadd.f32 %v5964_v23, %v1325_v31  ;;  %v5073_v33 = vpop.f32.mrb[17].mxu1 }
 0x7e8   :  { %v1332_v34 = vsel %vm516_vm6, %v1326_v32, -inf }
 0x7e9   :  { %1333 = vmax.xlane.f32.xlu1 %v1332_v34 }
 0x7fa   :  { %1351 = vrot.lane.b32.xlu1 %v5869_v63, %s5640_s4 }
 0x7fb   :  { %1427 = vrot.lane.b32.xlu0 %v5867_v62, %s5640_s4 }
 0x7fe   :  { %1507 = vrot.lane.b32.xlu1 %v5855_v61, %s5641_s29 }
 0x802   :  { %1585 = vrot.lane.b32.xlu1 %v5851_v59, %s5641_s29 }
 0x806   :  { %1583 = vrot.lane.b32.xlu1 %v5849_v58, %s5641_s29 }
 0x872   :  { %v1331_v35 = vpop.xlane.xlu0 %1330 }
 0x873   :  { %v1335_v37 = vsub.f32 %v1248_v27, %v1331_v35 }
 0x875   :  { %v1337_v40 = vmul.f32 1.442695, %v1335_v37  ;;  %v1952_v37 = vld [vmem:[%s6550_s12] sm:$0xff] }
 0x876   :  { %v1428_v41 = vpop.permute.xlu0 %1427  ;;  %v1334_v42 = vpop.xlane.xlu1 %1333 }
 0x877   :  { %5537 = vpow2.f32 %v1337_v40  ;;  %v1336_v43 = vsub.f32 %v1326_v32, %v1334_v42  ;;  %5080 = vmatpush3.msra.mxu1 %v1428_v41 }
 0x878   :  { %5089 = vmatprep.subr.mxu1 %v5636_v9 }
 0x879   :  { %v1339_v44 = vmul.f32 1.442695, %v1336_v43  ;;  %v1954_v43 = vld [vmem:[%s6550_s12 + $0x10] sm:$0xff] }
 0x87a   :  { %v1352_v45 = vpop.permute.xlu1 %1351 }
 0x87b   :  { %5539 = vpow2.f32 %v1339_v44  ;;  %5075 = vmatpush3.msra.mxu0 %v1352_v45  ;;  %v1955_v44 = vld [vmem:[%s6550_s12 + $0x18] sm:$0xff] }
 0x87c   :  { %5084 = vmatprep.subr.mxu0 %v5636_v9  ;;  %v5393_v45 = vpack.c.bf16 %v1955_v44, %v1954_v43 }
 0x87e   :  { %v1508_v49 = vpop.permute.xlu1 %1507 }
 0x881   :  { %v5538_v59 = vpop.eup %5537 }
 0x882   :  { %v1341_v61 = vsel %vm516_vm6, %v5538_v59, 0.0  ;;  %v1586_v53 = vpop.permute.xlu1 %1585 }
 0x883   :  { %1342 = vadd.xlane.f32.xlu0 %v1341_v61 }
 0x885   :  { %v5540_v58 = vpop.eup %5539 }
 0x886   :  { %v1344_v46 = vsel %vm516_vm6, %v5540_v58, 0.0  ;;  %v1584_v55 = vpop.permute.xlu1 %1583 }
 0x887   :  { %1345 = vadd.xlane.f32.xlu0 %v1344_v46  ;;  %v1866_v46 = vld [vmem:[%s6549_s11 + $0x8] sm:$0xff] }
 0x89d   :  { %1505 = vrot.lane.b32.xlu0 %v5853_v60, %s5641_s29 }
 0x910   :  { %v1343_v47 = vpop.xlane.xlu0 %1342 }
 0x911   :  { %5541 = vrcp.f32 %v1343_v47 }
 0x914   :  { %v1346_v48 = vpop.xlane.xlu0 %1345 }
 0x915   :  { %5543 = vrcp.f32 %v1346_v48  ;;  %v1867_v48 = vld [vmem:[%s6549_s11 + $0x10] sm:$0xff] }
 0x918   :  { %v1506_v60 = vpop.permute.xlu0 %1505 }
 0x91b   :  { %v5542_v50 = vpop.eup %5541 }
 0x91c   :  { %v1349_v51 = vmul.f32 %v5542_v50, %v5538_v59  ;;  %v4664_v59 = vld [vmem:[%s6543_s5] ss:$0 sm:$0xff] }
 0x91d   :  { %v6047_v61 = vadd.f32 %v4664_v59, %v5847_v56  ;;  %v1868_v56 = vld [vmem:[%s6549_s11 + $0x18] sm:$0xff]  ;;  %v2166_v59 = vld [vmem:[%s6553_s15] sm:$0xff] }
 0x91e   :  { %5077 = vmatmul.mubr.msk.f32.vlgmr.msra.gmra.mrb[12].mxu0 %vm516_vm6, %v1349_v51 }
 0x91f   :  { %v5544_v52 = vpop.eup %5543  ;;  %5085 = vmatpush3.xpose.msk.msra.mxu0 %vm516_vm6, %v1508_v49  ;;  %5086 = vmatprep.mubr.msk.f32.mxu0 %vm5638_vm4, %v5636_v9  ;;  %v5385_v49 = vpack.c.bf16 %v1868_v56, %v1867_v48  ;;  %v2169_v48 = vld [vmem:[%s6553_s15 + $0x18] sm:$0xff] }
 0x920   :  { %v1350_v54 = vmul.f32 %v5544_v52, %v5540_v58  ;;  %5094 = vmatprep.subr.mxu0 %v5636_v9  ;;  %v1865_v58 = vld [vmem:[%s6549_s11] sm:$0xff] }
 0x921   :  { %v5381_v47 = vpack.c.bf16 %v1866_v46, %v1865_v58  ;;  %v2167_v58 = vld [vmem:[%s6553_s15 + $0x8] sm:$0xff]  ;;  %v2168_v46 = vld [vmem:[%s6553_s15 + $0x10] sm:$0xff] }
 0x922   :  { %5082 = vmatmul.mubr.msk.f32.vlgmr.msra.gmra.mrb[18].mxu1 %vm516_vm6, %v1350_v54  ;;  %5087 = vmatmul.mubr.msk.f32.vlgmr.msra.gmra.mrb[14].mxu0 %vm516_vm6, %v1506_v60  ;;  %v5405_v56 = vpack.c.bf16 %v2169_v48, %v2168_v46  ;;  %v4717_v46 = vld [vmem:[%s6547_s9 + $0x20] sm:$0xff] }
 0x923   :  { %5090 = vmatpush3.xpose.msk.msra.mxu1 %vm516_vm6, %v1586_v53  ;;  %5091 = vmatprep.mubr.msk.f32.mxu1 %vm5638_vm4, %v5636_v9 }
 0x924   :  { %5099 = vmatprep.subr.mxu1 %v5636_v9  ;;  %5096 = vmatprep.mubr.msk.f32.mxu0 %vm5638_vm4, %v5636_v9 }
 0x926   :  { %5092 = vmatmul.mubr.msk.f32.vlgmr.msra.gmra.mrb[20].mxu1 %vm516_vm6, %v1584_v55 }
 0x927   :  { %5101 = vmatprep.mubr.msk.f32.mxu1 %vm5638_vm4, %v5636_v9 }
 0x9f1   :  { %v1423_v57 = vpop.f32.mrb[12].mxu0 }
 0x9f2   :  { %v5078_v1 = vpop.f32.mrb[13].mxu0 }
 0x9f5   :  { %v1499_v3 = vpop.f32.mrb[18].mxu1  ;;  %v1579_v5 = vpop.f32.mrb[14].mxu0 }
 0x9f6   :  { %v1580_v8 = vadd.f32 %v6007_v2, %v1579_v5  ;;  %v5083_v10 = vpop.f32.mrb[19].mxu1  ;;  %v5088_v11 = vpop.f32.mrb[15].mxu0 }
 0x9f7   :  { %v2029_v11 = vld [vmem:[%s6551_s13] sm:$0xff] }
 0x9f8   :  { %v1661_v12 = vsel %vm516_vm6, %v1580_v8, -inf }
 0x9f9   :  { %1662 = vmax.xlane.f32.xlu0 %v1661_v12  ;;  %v1657_v15 = vpop.f32.mrb[20].mxu1  ;;  %v2030_v12 = vld [vmem:[%s6551_s13 + $0x8] sm:$0xff] }
 0x9fa   :  { %v1658_v16 = vadd.f32 %v6007_v2, %v1657_v15  ;;  %v5093_v17 = vpop.f32.mrb[21].mxu1 }
 0x9fc   :  { %v1664_v18 = vsel %vm516_vm6, %v1658_v16, -inf }
 0x9fd   :  { %1665 = vmax.xlane.f32.xlu1 %v1664_v18 }
 0xa0e   :  { %1683 = vrot.lane.b32.xlu1 %v5869_v63, %s5641_s29 }
 0xa12   :  { %1837 = vrot.lane.b32.xlu1 %v5959_v21, %s5642_s6 }
 0xa16   :  { %1839 = vrot.lane.b32.xlu1 %v5966_v25, %s5642_s6 }
 0xa1a   :  { %1847 = vrot.lane.b32.xlu1 %v1499_v3, %s5643_s19 }
 0xa86   :  { %v1663_v19 = vpop.xlane.xlu0 %1662 }
 0xa87   :  { %v1667_v20 = vsub.f32 %v1580_v8, %v1663_v19  ;;  %v2031_v19 = vld [vmem:[%s6551_s13 + $0x10] sm:$0xff] }
 0xa89   :  { %v1669_v22 = vmul.f32 1.442695, %v1667_v20  ;;  %v2032_v20 = vld [vmem:[%s6551_s13 + $0x18] sm:$0xff] }
 0xa8a   :  { %v1666_v26 = vpop.xlane.xlu1 %1665 }
 0xa8b   :  { %5545 = vpow2.f32 %v1669_v22  ;;  %v1668_v27 = vsub.f32 %v1658_v16, %v1666_v26  ;;  %v5399_v26 = vpack.c.bf16 %v2032_v20, %v2031_v19  ;;  %v2259_v20 = vld [vmem:[%s6554_s16 + $0x30] sm:$0xff] }
 0xa8d   :  { %v1671_v28 = vmul.f32 1.442695, %v1668_v27 }
 0xa8e   :  { %v1684_v29 = vpop.permute.xlu1 %1683 }
 0xa8f   :  { %5547 = vpow2.f32 %v1671_v28  ;;  %5095 = vmatpush3.msra.mxu0 %v1684_v29 }
 0xa90   :  { %5382 = vmatprep.subr.bf16.mxu0 %v5381_v47 }
 0xa92   :  { %v1838_v55 = vpop.permute.xlu1 %1837 }
 0xa93   :  { %v1859_v3 = vsel %vm516_vm6, %v5914_v36, %v1838_v55  ;;  %v5396_v36 = vpack.c.bf16 %v2030_v12, %v2029_v11  ;;  %v2258_v55 = vld [vmem:[%s6554_s16 + $0x28] sm:$0xff] }
 0xa95   :  { %v5546_v63 = vpop.eup %5545 }
 0xa96   :  { %v1673_v30 = vsel %vm516_vm6, %v5546_v63, 0.0 }
 0xa97   :  { %1674 = vadd.xlane.f32.xlu0 %v1673_v30 }
 0xa99   :  { %v5548_v21 = vpop.eup %5547 }
 0xa9a   :  { %v1676_v25 = vsel %vm516_vm6, %v5548_v21, 0.0 }
 0xa9b   :  { %1677 = vadd.xlane.f32.xlu0 %v1676_v25 }
 0xab1   :  { %1759 = vrot.lane.b32.xlu0 %v5867_v62, %s5641_s29  ;;  %v1953_v62 = vld [vmem:[%s6550_s12 + $0x8] sm:$0xff] }
 0xab2   :  { %v5390_v41 = vpack.c.bf16 %v1953_v62, %v1952_v37 }
 0xab5   :  { %1845 = vrot.lane.b32.xlu0 %v1423_v57, %s5643_s19  ;;  %v1840_v57 = vpop.permute.xlu1 %1839 }
 0xab6   :  { %v1860_v16 = vsel %vm516_vm6, %v5921_v39, %v1840_v57  ;;  %v5645_v39 = vmov 1966171168  }
 0xab7   :  { %v2108_v27 = vunpack.c.l.s4 %v5645_v39 }
 0xab9   :  { %v1848_v5 = vpop.permute.xlu1 %1847  ;;  %v2109_v29 = vunpack.c.0.s8 %v2108_v27 }
 0xaba   :  { %v1862_v17 = vsel %vm78_vm0, %v1860_v16, %v1848_v5 }
 0xb24   :  { %v1675_v31 = vpop.xlane.xlu0 %1674 }
 0xb25   :  { %5549 = vrcp.f32 %v1675_v31 }
 0xb28   :  { %v1678_v32 = vpop.xlane.xlu0 %1677 }
 0xb29   :  { %5551 = vrcp.f32 %v1678_v32 }
 0xb2c   :  { %v1760_v33 = vpop.permute.xlu0 %1759 }
 0xb2d   :  { %5100 = vmatpush3.msra.mxu1 %v1760_v33 }
 0xb2e   :  { %5389 = vmatprep.subr.bf16.mxu1 %v5637_v24 }
 0xb2f   :  { %v5550_v34 = vpop.eup %5549 }
 0xb30   :  { %v1681_v35 = vmul.f32 %v5550_v34, %v5546_v63  ;;  %v1846_v1 = vpop.permute.xlu0 %1845  ;;  %v2111_v63 = vshrl.u32 %v62_v6, 7 }
 0xb31   :  { %v1861_v8 = vsel %vm78_vm0, %v1859_v3, %v1846_v1 }
 0xb32   :  { %5097 = vmatmul.mubr.msk.f32.vlgmr.msra.gmra.mrb[16].mxu0 %vm516_vm6, %v1681_v35  ;;  %v6095_v31 = vsub.s32 %v2109_v29, %v2111_v63  ;;  %v6098_v34 = vsub.s32 0, %v2111_v63 }
 0xb33   :  { %v5552_v40 = vpop.eup %5551  ;;  %5384 = vmatpush3.bf16.msra.mxu0 %v5381_v47  ;;  %v5401_v47 = vpack.c.bf16 %v2167_v58, %v2166_v59  ;;  %v4726_v59 = vld [vmem:[%s6548_s10 + $0x38] sm:$0xff] }
 0xb34   :  { %v1682_v42 = vmul.f32 %v5552_v40, %v5548_v21  ;;  %5386 = vmatprep.subr.bf16.mxu0 %v5385_v49 }
 0xb36   :  { %5102 = vmatmul.mubr.msk.f32.vlgmr.msra.gmra.mrb[22].mxu1 %vm516_vm6, %v1682_v42 }
 0xb37   :  { %5391 = vmatpush3.bf16.msra.mxu1 %v5390_v41  ;;  %5123 = vmatprep.mubr.msk.f32.mxu1 %vm5638_vm4, %v5636_v9 }
 0xb38   :  { %5392 = vmatprep.subr.bf16.mxu1 %v5637_v24  ;;  %5388 = vmatpush3.bf16.msra.mxu0 %v5385_v49  ;;  %v2253_v49 = vld [vmem:[%s6554_s16] sm:$0xff] }
 0xb39   :  { %5395 = vmatprep.subr.bf16.mxu0 %v5637_v24 }
 0xb3b   :  { %5394 = vmatpush3.bf16.msra.mxu1 %v5393_v45 }
 0xb3c   :  { %5402 = vmatprep.subr.bf16.mxu1 %v5401_v47 }
 0xb3e   :  { %5124 = vmatmul.mubr.msk.f32.vlgmr.msra.gmra.mrb[24].mxu1 %vm248_vm3, %v6047_v61 }
 0xb3f   :  { %5404 = vmatpush3.bf16.msra.mxu1 %v5401_v47  ;;  %v4718_v47 = vld [vmem:[%s6547_s9 + $0x28] sm:$0xff] }
 0xb40   :  { %5406 = vmatprep.subr.bf16.mxu1 %v5405_v56  ;;  %v5433_v48 = vpack.c.bf16 %v4718_v47, %v4717_v46 }
 0xb43   :  { %5408 = vmatpush3.bf16.msra.mxu1 %v5405_v56 }
 0xc05   :  { %v1755_v50 = vpop.f32.mrb[16].mxu0 }
 0xc06   :  { %1853 = vrot.lane.b32.xlu0 %v1755_v50, %s5644_s22  ;;  %v5098_v51 = vpop.f32.mrb[17].mxu0  ;;  %v2254_v50 = vld [vmem:[%s6554_s16 + $0x8] sm:$0xff] }
 0xc07   :  { %v2255_v51 = vld [vmem:[%s6554_s16 + $0x10] sm:$0xff] }
 0xc09   :  { %v1831_v52 = vpop.f32.mrb[22].mxu1 }
 0xc0a   :  { %1855 = vrot.lane.b32.xlu1 %v1831_v52, %s5644_s22  ;;  %v5103_v53 = vpop.f32.mrb[23].mxu1  ;;  %v5409_v52 = vpack.c.bf16 %v2254_v50, %v2253_v49 }
 0xc0b   :  { %v2256_v53 = vld [vmem:[%s6554_s16 + $0x18] sm:$0xff] }
 0xc11   :  { %v2025_v54 = vpop.f32.mrb[24].mxu1 }
 0xc12   :  { %v5125_v60 = vpop.f32.mrb[25].mxu1 }
 0xc13   :  { %v2257_v60 = vld [vmem:[%s6554_s16 + $0x20] sm:$0xff] }
 0xc14   :  { %v5417_v57 = vpack.c.bf16 %v2258_v55, %v2257_v60  ;;  %v4710_v60 = vld [vmem:[%s6545_s7 + $0x1] ss:$0 sm:$0xff] }
 0xc78   :  { %v1854_v10 = vpop.permute.xlu0 %1853 }
 0xc79   :  { %v1863_v15 = vsel %vm171_vm5, %v1861_v8, %v1854_v10 }
 0xc7a   :  { %5112 = vmatprep.mubr.msk.f32.mxu0 %vm248_vm3, %v1863_v15  ;;  %v4704_v15 = vld [vmem:[%s6552_s14] ss:$0 sm:$0xff] }
 0xc7c   :  { %v1856_v18 = vpop.permute.xlu1 %1855 }
 0xc7d   :  { %v1864_v22 = vsel %vm171_vm5, %v1862_v17, %v1856_v18 }
 0xc7e   :  { %5113 = vmatmul.mubr.msk.f32.vlgmr.msra.gmra.mrb[18].mxu0 %vm248_vm3, %v1864_v22  ;;  %v2260_v22 = vld [vmem:[%s6554_s16 + $0x38] sm:$0xff] }
 0xc7f   :  { %5397 = vmatpush3.bf16.msra.mxu0 %v5396_v36  ;;  %5134 = vmatprep.mubr.msk.f32.mxu0 %vm5638_vm4, %v5636_v9 }
 0xc80   :  { %5398 = vmatprep.subr.bf16.mxu0 %v5637_v24 }
 0xc83   :  { %5400 = vmatpush3.bf16.msra.mxu0 %v5399_v26  ;;  %v5421_v26 = vpack.c.bf16 %v2260_v22, %v2259_v20 }
 0xc84   :  { %5410 = vmatprep.subr.bf16.mxu0 %v5409_v52 }
 0xc86   :  { %5135 = vmatmul.mubr.msk.f32.vlgmr.msra.gmra.mrb[20].mxu0 %vm248_vm3, %v2025_v54  ;;  %v5413_v54 = vpack.c.bf16 %v2256_v53, %v2255_v51 }
 0xc87   :  { %5412 = vmatpush3.bf16.msra.mxu0 %v5409_v52 }
 0xc88   :  { %5414 = vmatprep.subr.bf16.mxu0 %v5413_v54 }
 0xc8b   :  { %5416 = vmatpush3.bf16.msra.mxu0 %v5413_v54 }
 0xc8c   :  { %5418 = vmatprep.subr.bf16.mxu0 %v5417_v57 }
 0xc8f   :  { %5420 = vmatpush3.bf16.msra.mxu0 %v5417_v57 }
 0xc90   :  { %5422 = vmatprep.subr.bf16.mxu0 %v5421_v26 }
 0xc93   :  { %5424 = vmatpush3.bf16.msra.mxu0 %v5421_v26 }
 0xd51   :  { %v5114_v28 = vpop.f32.mrb[18].mxu0 }
 0xd52   :  { %v1951_v30 = vadd.f32 %v5114_v28, %v5767_v13  ;;  %v1941_v21 = vpop.f32.mrb[19].mxu0 }
 0xd53   :  { %v1950_v25 = vadd.f32 %v1941_v21, %v5769_v14 }
 0xd59   :  { %v2102_v32 = vpop.f32.mrb[20].mxu0 }
 0xd5a   :  { %v2113_v33 = vrot.slane %v2102_v32, %v6095_v31  ;;  %v5136_v35 = vpop.f32.mrb[21].mxu0 }
 0xd5c   :  { %v2114_v37 = vcombine.high %v2113_v33, %v2113_v33  ;;  %v2121_v62 = vrot.slane %v2113_v33, %v6095_v31 }
 0xd5e   :  { %v2128_v40 = vrot.slane %v2114_v37, %v6095_v31  ;;  %v2132_v6 = vrot.slane %v2121_v62, %v6098_v34  ;;  %v4711_v62 = vld [vmem:[%s6546_s8 + $0x20] sm:$0xff] }
 0xd60   :  { %v2136_v13 = vrot.slane %v2128_v40, %v6098_v34  ;;  %v6104_v41 = vadd.f32 %v2132_v6, %v1950_v25  ;;  %v4712_v40 = vld [vmem:[%s6546_s8 + $0x28] sm:$0xff]  ;;  %v4723_v6 = vld [vmem:[%s6548_s10 + $0x20] sm:$0xff] }
 0xd62   :  { %v2142_v14 = vmul.f32 %v6104_v41, %v6104_v41  ;;  %v2140_v42 = vadd.f32 %v2136_v13, %v1951_v30  ;;  %v5425_v13 = vpack.c.bf16 %v4712_v40, %v4711_v62 }
 0xd64   :  { %v2144_v43 = vsel %vm248_vm3, %v2142_v14, 0.0  ;;  %v2143_v44 = vmul.f32 %v2140_v42, %v2140_v42  ;;  %v4713_v14 = vld [vmem:[%s6546_s8 + $0x30] sm:$0xff]  ;;  %5426 = vmatprep.subr.bf16.mxu1 %v5425_v13 }
 0xd65   :  { %2145 = vadd.xlane.f32.xlu0 %v2144_v43 }
 0xd66   :  { %v2147_v45 = vsel %vm248_vm3, %v2143_v44, 0.0 }
 0xd67   :  { %2148 = vadd.xlane.f32.xlu1 %v2147_v45  ;;  %v4725_v45 = vld [vmem:[%s6548_s10 + $0x30] sm:$0xff] }
 0xd68   :  { %v5445_v58 = vpack.c.bf16 %v4726_v59, %v4725_v45 }
 0xdf2   :  { %v2146_v1 = vpop.xlane.xlu0 %2145 }
 0xdf3   :  { %v2150_v3 = vmul.f32 0.03125, %v2146_v1 }
 0xdf4   :  { %v2149_v5 = vpop.xlane.xlu1 %2148 }
 0xdf5   :  { %v2152_v8 = vadd.f32 1e-06, %v2150_v3  ;;  %v2151_v10 = vmul.f32 0.03125, %v2149_v5  ;;  %v4719_v3 = vld [vmem:[%s6547_s9 + $0x30] sm:$0xff]  ;;  %v4720_v5 = vld [vmem:[%s6547_s9 + $0x38] sm:$0xff] }
 0xdf7   :  { %5553 = vrsqrt.f32 %v2152_v8  ;;  %v2153_v11 = vadd.f32 1e-06, %v2151_v10 }
 0xdf9   :  { %5555 = vrsqrt.f32 %v2153_v11  ;;  %v5437_v11 = vpack.c.bf16 %v4720_v5, %v4719_v3 }
 0xe01   :  { %v5554_v12 = vpop.eup %5553 }
 0xe02   :  { %v2156_v16 = vmul.f32 %v5554_v12, %v6104_v41 }
 0xe03   :  { %v5556_v36 = vpop.eup %5555 }
 0xe04   :  { %v2157_v17 = vmul.f32 %v5556_v36, %v2140_v42  ;;  %v2164_v18 = vmul.f32 %v4704_v15, %v2156_v16 }
 0xe06   :  { %v2165_v19 = vmul.f32 %v4704_v15, %v2157_v17  ;;  %5145 = vmatprep.mubr.msk.f32.mxu1 %vm248_vm3, %v2164_v18 }
 0xe08   :  { %5146 = vmatmul.mubr.msk.f32.vlgmr.msra.gmra.mrb[26].mxu1 %vm248_vm3, %v2165_v19 }
 0xe09   :  { %5428 = vmatpush3.bf16.msra.mxu1 %v5425_v13 }
 0xedb   :  { %v5147_v39 = vpop.f32.mrb[26].mxu1 }
 0xedc   :  { %v2242_v27 = vpop.f32.mrb[27].mxu1  ;;  %v2252_v29 = vmax.f32 %v5147_v39, 0.0 }
 0xedd   :  { %v2251_v28 = vmax.f32 %v2242_v27, 0.0 }
 0xedf   :  { %5164 = vmatprep.mubr.msk.f32.mxu0 %vm2261_vm7, %v2251_v28 }
 0xee0   :  { %5165 = vmatmul.mubr.msk.f32.vlgmr.msra.gmra.mrb[22].mxu0 %vm2261_vm7, %v2252_v29 }
 0xfb3   :  { %v5166_v63 = vpop.f32.mrb[22].mxu0 }
 0xfb4   :  { %v2334_v30 = vpop.f32.mrb[23].mxu0  ;;  %v6154_v21 = vadd.f32 %v5166_v63, %v2140_v42  ;;  %v4714_v42 = vld [vmem:[%s6546_s8 + $0x38] sm:$0xff] }
 0xfb5   :  { %v6157_v25 = vadd.f32 %v2334_v30, %v6104_v41  ;;  %v4724_v41 = vld [vmem:[%s6548_s10 + $0x28] sm:$0xff]  ;;  %v5429_v44 = vpack.c.bf16 %v4714_v42, %v4713_v14 }
 0xfb6   :  { %v2348_v35 = vmul.f32 %v6154_v21, %v6154_v21  ;;  %v5441_v43 = vpack.c.bf16 %v4724_v41, %v4723_v6 }
 0xfb7   :  { %v2347_v32 = vmul.f32 %v6157_v25, %v6157_v25  ;;  %5430 = vmatprep.subr.bf16.mxu1 %v5429_v44 }
 0xfb8   :  { %v2352_v37 = vsel %vm248_vm3, %v2348_v35, 0.0  ;;  %5442 = vmatprep.subr.bf16.mxu0 %v5441_v43  ;;  %5432 = vmatpush3.bf16.msra.mxu1 %v5429_v44 }
 0xfb9   :  { %v2349_v33 = vsel %vm248_vm3, %v2347_v32, 0.0  ;;  %5444 = vmatpush3.bf16.msra.mxu0 %v5441_v43  ;;  %5434 = vmatprep.subr.bf16.mxu1 %v5433_v48 }
 0xfba   :  { %2350 = vadd.xlane.f32.xlu0 %v2349_v33  ;;  %5446 = vmatprep.subr.bf16.mxu0 %v5445_v58 }
 0xfbd   :  { %5448 = vmatpush3.bf16.msra.mxu0 %v5445_v58 }
 0xfbe   :  { %2353 = vadd.xlane.f32.xlu0 %v2352_v37  ;;  %5210 = vmatprep.subr.mxu0 %v5636_v9 }
0x1047   :  { %v2351_v56 = vpop.xlane.xlu0 %2350 }
0x1048   :  { %v2355_v49 = vmul.f32 0.03125, %v2351_v56 }
0x104a   :  { %v2357_v50 = vadd.f32 1e-06, %v2355_v49 }
0x104b   :  { %v2354_v51 = vpop.xlane.xlu0 %2353 }
0x104c   :  { %5557 = vrsqrt.f32 %v2357_v50  ;;  %v2356_v52 = vmul.f32 0.03125, %v2354_v51 }
0x104e   :  { %v2358_v53 = vadd.f32 1e-06, %v2356_v52 }
0x1050   :  { %5559 = vrsqrt.f32 %v2358_v53 }
0x1056   :  { %v5558_v54 = vpop.eup %5557 }
0x1057   :  { %v2361_v55 = vmul.f32 %v5558_v54, %v6157_v25 }
0x1059   :  { %v2369_v57 = vmul.f32 %v4710_v60, %v2361_v55 }
0x105a   :  { %v5560_v1 = vpop.eup %5559 }
0x105b   :  { %v2362_v8 = vmul.f32 %v5560_v1, %v6154_v21  ;;  %5175 = vmatprep.mubr.msk.f32.mxu1 %vm248_vm3, %v2369_v57  ;;  %5197 = vmatprep.mubr.msk.f32.mxu0 %vm248_vm3, %v2369_v57 }
0x105d   :  { %v2370_v10 = vmul.f32 %v4710_v60, %v2362_v8 }
0x105f   :  { %5176 = vmatmul.mubr.msk.f32.vlgmr.msra.gmra.mrb[28].mxu1 %vm248_vm3, %v2370_v10  ;;  %5198 = vmatmul.mubr.msk.f32.vlgmr.msra.gmra.mrb[24].mxu0 %vm248_vm3, %v2370_v10 }
0x1060   :  { %5436 = vmatpush3.bf16.msra.mxu1 %v5433_v48  ;;  %5186 = vmatprep.mubr.msk.f32.mxu1 %vm248_vm3, %v2369_v57 }
0x1061   :  { %5438 = vmatprep.subr.bf16.mxu1 %v5437_v11  ;;  %5212 = vmatprep.mubr.msk.f32.mxu0 %vm5638_vm4, %v5636_v9 }
0x1064   :  { %5440 = vmatpush3.bf16.msra.mxu1 %v5437_v11 }
0x1065   :  { %5200 = vmatprep.subr.mxu1 %v5636_v9 }
0x1067   :  { %5187 = vmatmul.mubr.msk.f32.vlgmr.msra.gmra.mrb[30].mxu1 %vm248_vm3, %v2370_v10 }
0x1068   :  { %5202 = vmatprep.mubr.msk.f32.mxu1 %vm5638_vm4, %v5636_v9 }
0x1132   :  { %v6218_v12 = vpop.f32.mrb[28].mxu1  ;;  %v6220_v15 = vpop.f32.mrb[24].mxu0 }
0x1133   :  { %v6222_v16 = vpop.f32.mrb[29].mxu1  ;;  %v6224_v36 = vpop.f32.mrb[25].mxu0 }
0x1134   :  { %5211 = vmatpush3.msra.mxu0 %v6224_v36 }
0x1135   :  { %5220 = vmatprep.subr.mxu0 %v5636_v9 }
0x113a   :  { %v6228_v17 = vpop.f32.mrb[30].mxu1 }
0x113b   :  { %v6230_v18 = vpop.f32.mrb[31].mxu1 }
0x113c   :  { %5201 = vmatpush3.xpose.msk.msra.mxu1 %vm516_vm6, %v6230_v18 }
0x113d   :  { %5205 = vmatprep.subr.mxu1 %v5636_v9 }
0x113f   :  { %5203 = vmatmul.mubr.msk.f32.vlgmr.msra.gmra.mrb[32].mxu1 %vm516_vm6, %v6222_v16 }
0x1140   :  { %5206 = vmatpush3.xpose.msk.msra.mxu1 %vm516_vm6, %v6228_v17  ;;  %5207 = vmatprep.mubr.msk.f32.mxu1 %vm5638_vm4, %v5636_v9 }
0x1141   :  { %5215 = vmatprep.subr.mxu1 %v5636_v9 }
0x1143   :  { %5208 = vmatmul.mubr.msk.f32.vlgmr.msra.gmra.mrb[34].mxu1 %vm516_vm6, %v6218_v12 }
0x1144   :  { %5216 = vmatpush3.msra.mxu1 %v6220_v15  ;;  %5217 = vmatprep.mubr.msk.f32.mxu1 %vm5638_vm4, %v5636_v9 }
0x1145   :  { %5225 = vmatprep.subr.mxu1 %v5636_v9 }
0x1212   :  { %v2690_v19 = vpop.f32.mrb[32].mxu1 }
0x1213   :  { %v2691_v20 = vadd.f32 %v2690_v19, %v5882_v0  ;;  %v5204_v22 = vpop.f32.mrb[33].mxu1 }
0x1215   :  { %v2770_v26 = vsel %vm516_vm6, %v2691_v20, -inf }
0x1216   :  { %2771 = vmax.xlane.f32.xlu1 %v2770_v26  ;;  %v2766_v39 = vpop.f32.mrb[34].mxu1 }
0x1217   :  { %v2767_v27 = vadd.f32 %v2766_v39, %v5882_v0  ;;  %v5209_v28 = vpop.f32.mrb[35].mxu1 }
0x1219   :  { %v2773_v29 = vsel %vm516_vm6, %v2767_v27, -inf }
0x121a   :  { %2774 = vmax.xlane.f32.xlu0 %v2773_v29 }
0x1227   :  { %2941 = vrot.lane.b32.xlu1 %v6230_v18, %s5639_s24 }
0x12a3   :  { %v2772_v63 = vpop.xlane.xlu1 %2771 }
0x12a4   :  { %v2776_v30 = vsub.f32 %v2691_v20, %v2772_v63 }
0x12a6   :  { %v2778_v32 = vmul.f32 1.442695, %v2776_v30 }
0x12a7   :  { %v2775_v33 = vpop.xlane.xlu0 %2774  ;;  %v2942_v13 = vpop.permute.xlu1 %2941 }
0x12a8   :  { %5561 = vpow2.f32 %v2778_v32  ;;  %v2777_v35 = vsub.f32 %v2767_v27, %v2775_v33 }
0x12aa   :  { %v2780_v37 = vmul.f32 1.442695, %v2777_v35 }
0x12ac   :  { %5563 = vpow2.f32 %v2780_v37 }
0x12b2   :  { %v5562_v62 = vpop.eup %5561 }
0x12b3   :  { %v2782_v40 = vsel %vm516_vm6, %v5562_v62, 0.0 }
0x12b4   :  { %2783 = vadd.xlane.f32.xlu1 %v2782_v40 }
0x12b6   :  { %v5564_v0 = vpop.eup %5563 }
0x12b7   :  { %v2785_v6 = vsel %vm516_vm6, %v5564_v0, 0.0 }
0x12b8   :  { %2786 = vadd.xlane.f32.xlu0 %v2785_v6 }
0x12c5   :  { %2939 = vrot.lane.b32.xlu1 %v6222_v16, %s5639_s24 }
0x12c9   :  { %3017 = vrot.lane.b32.xlu1 %v6218_v12, %s5639_s24 }
0x12ce   :  { %3019 = vrot.lane.b32.xlu0 %v6228_v17, %s5639_s24 }
0x1341   :  { %v2784_v41 = vpop.xlane.xlu1 %2783 }
0x1342   :  { %5565 = vrcp.f32 %v2784_v41 }
0x1345   :  { %v2787_v14 = vpop.xlane.xlu0 %2786  ;;  %v2940_v45 = vpop.permute.xlu1 %2939 }
0x1346   :  { %5567 = vrcp.f32 %v2787_v14 }
0x1349   :  { %v3020_v58 = vpop.permute.xlu0 %3019  ;;  %v3018_v46 = vpop.permute.xlu1 %3017 }
0x134c   :  { %v5566_v42 = vpop.eup %5565 }
0x134d   :  { %v2790_v43 = vmul.f32 %v5566_v42, %v5562_v62 }
0x134f   :  { %5213 = vmatmul.mubr.msk.f32.vlgmr.msra.gmra.mrb[26].mxu0 %vm516_vm6, %v2790_v43 }
0x1350   :  { %v5568_v44 = vpop.eup %5567  ;;  %5221 = vmatpush3.xpose.msk.msra.mxu0 %vm516_vm6, %v2942_v13  ;;  %5222 = vmatprep.mubr.msk.f32.mxu0 %vm5638_vm4, %v5636_v9 }
0x1351   :  { %v2791_v59 = vmul.f32 %v5568_v44, %v5564_v0  ;;  %5230 = vmatprep.subr.mxu0 %v5636_v9 }
0x1353   :  { %5218 = vmatmul.mubr.msk.f32.vlgmr.msra.gmra.mrb[36].mxu1 %vm516_vm6, %v2791_v59  ;;  %5223 = vmatmul.mubr.msk.f32.vlgmr.msra.gmra.mrb[28].mxu0 %vm516_vm6, %v2940_v45 }
0x1354   :  { %5226 = vmatpush3.xpose.msk.msra.mxu1 %vm516_vm6, %v3020_v58  ;;  %5227 = vmatprep.mubr.msk.f32.mxu1 %vm5638_vm4, %v5636_v9 }
0x1355   :  { %5235 = vmatprep.subr.mxu1 %v5636_v9  ;;  %5232 = vmatprep.mubr.msk.f32.mxu0 %vm5638_vm4, %v5636_v9 }
0x1357   :  { %5228 = vmatmul.mubr.msk.f32.vlgmr.msra.gmra.mrb[38].mxu1 %vm516_vm6, %v3018_v46 }
0x1358   :  { %5237 = vmatprep.mubr.msk.f32.mxu1 %vm5638_vm4, %v5636_v9 }
0x1422   :  { %v6278_v47 = vpop.f32.mrb[26].mxu0 }
0x1423   :  { %v5214_v48 = vpop.f32.mrb[27].mxu0 }
0x1426   :  { %v6280_v56 = vpop.f32.mrb[36].mxu1  ;;  %v3013_v49 = vpop.f32.mrb[28].mxu0 }
0x1427   :  { %v3014_v50 = vadd.f32 %v5919_v38, %v3013_v49  ;;  %v5219_v51 = vpop.f32.mrb[37].mxu1  ;;  %v5224_v52 = vpop.f32.mrb[29].mxu0 }
0x1429   :  { %v3095_v53 = vsel %vm516_vm6, %v3014_v50, -inf }
0x142a   :  { %3096 = vmax.xlane.f32.xlu0 %v3095_v53  ;;  %v3091_v54 = vpop.f32.mrb[38].mxu1 }
0x142b   :  { %v3092_v60 = vadd.f32 %v5919_v38, %v3091_v54  ;;  %v5229_v55 = vpop.f32.mrb[39].mxu1 }
0x142d   :  { %v3098_v57 = vsel %vm516_vm6, %v3092_v60, -inf }
0x142e   :  { %3099 = vmax.xlane.f32.xlu1 %v3098_v57 }
0x143f   :  { %3118 = vrot.lane.b32.xlu1 %v6224_v36, %s5639_s24 }
0x1440   :  { %3195 = vrot.lane.b32.xlu0 %v6220_v15, %s5639_s24 }
0x1443   :  { %3274 = vrot.lane.b32.xlu1 %v6230_v18, %s5640_s4 }
0x1447   :  { %3352 = vrot.lane.b32.xlu1 %v6228_v17, %s5640_s4 }
0x144b   :  { %3350 = vrot.lane.b32.xlu1 %v6218_v12, %s5640_s4 }
0x14b7   :  { %v3097_v38 = vpop.xlane.xlu0 %3096 }
0x14b8   :  { %v3101_v1 = vsub.f32 %v3014_v50, %v3097_v38 }
0x14ba   :  { %v3103_v3 = vmul.f32 1.442695, %v3101_v1 }
0x14bb   :  { %v3196_v5 = vpop.permute.xlu0 %3195  ;;  %v3100_v8 = vpop.xlane.xlu1 %3099 }
0x14bc   :  { %5569 = vpow2.f32 %v3103_v3  ;;  %v3102_v10 = vsub.f32 %v3092_v60, %v3100_v8  ;;  %5236 = vmatpush3.msra.mxu1 %v3196_v5 }
0x14bd   :  { %5245 = vmatprep.subr.mxu1 %v5636_v9 }
0x14be   :  { %v3105_v11 = vmul.f32 1.442695, %v3102_v10 }
0x14bf   :  { %v3119_v19 = vpop.permute.xlu1 %3118 }
0x14c0   :  { %5571 = vpow2.f32 %v3105_v11  ;;  %5231 = vmatpush3.msra.mxu0 %v3119_v19 }
0x14c1   :  { %5240 = vmatprep.subr.mxu0 %v5636_v9 }
0x14c3   :  { %v3275_v29 = vpop.permute.xlu1 %3274 }
0x14c6   :  { %v5570_v20 = vpop.eup %5569 }
0x14c7   :  { %v3107_v22 = vsel %vm516_vm6, %v5570_v20, 0.0  ;;  %v3353_v33 = vpop.permute.xlu1 %3352 }
0x14c8   :  { %3108 = vadd.xlane.f32.xlu0 %v3107_v22 }
0x14ca   :  { %v5572_v26 = vpop.eup %5571 }
0x14cb   :  { %v3110_v39 = vsel %vm516_vm6, %v5572_v26, 0.0  ;;  %v3351_v62 = vpop.permute.xlu1 %3350 }
0x14cc   :  { %3111 = vadd.xlane.f32.xlu0 %v3110_v39 }
0x14e2   :  { %3272 = vrot.lane.b32.xlu0 %v6222_v16, %s5640_s4 }
0x1555   :  { %v3109_v27 = vpop.xlane.xlu0 %3108 }
0x1556   :  { %5573 = vrcp.f32 %v3109_v27 }
0x1559   :  { %v3112_v28 = vpop.xlane.xlu0 %3111 }
0x155a   :  { %5575 = vrcp.f32 %v3112_v28 }
0x155d   :  { %v3273_v37 = vpop.permute.xlu0 %3272 }
0x1560   :  { %v5574_v63 = vpop.eup %5573 }
0x1561   :  { %v3115_v30 = vmul.f32 %v5574_v63, %v5570_v20 }
0x1563   :  { %5233 = vmatmul.mubr.msk.f32.vlgmr.msra.gmra.mrb[30].mxu0 %vm516_vm6, %v3115_v30 }
0x1564   :  { %v5576_v32 = vpop.eup %5575  ;;  %5241 = vmatpush3.xpose.msk.msra.mxu0 %vm516_vm6, %v3275_v29  ;;  %5242 = vmatprep.mubr.msk.f32.mxu0 %vm5638_vm4, %v5636_v9 }
0x1565   :  { %v3116_v35 = vmul.f32 %v5576_v32, %v5572_v26  ;;  %5250 = vmatprep.subr.mxu0 %v5636_v9 }
0x1567   :  { %5238 = vmatmul.mubr.msk.f32.vlgmr.msra.gmra.mrb[40].mxu1 %vm516_vm6, %v3116_v35  ;;  %5243 = vmatmul.mubr.msk.f32.vlgmr.msra.gmra.mrb[32].mxu0 %vm516_vm6, %v3273_v37 }
0x1568   :  { %5246 = vmatpush3.xpose.msk.msra.mxu1 %vm516_vm6, %v3353_v33  ;;  %5247 = vmatprep.mubr.msk.f32.mxu1 %vm5638_vm4, %v5636_v9 }
0x1569   :  { %5255 = vmatprep.subr.mxu1 %v5636_v9  ;;  %5252 = vmatprep.mubr.msk.f32.mxu0 %vm5638_vm4, %v5636_v9 }
0x156b   :  { %5248 = vmatmul.mubr.msk.f32.vlgmr.msra.gmra.mrb[42].mxu1 %vm516_vm6, %v3351_v62 }
0x156c   :  { %5257 = vmatprep.mubr.msk.f32.mxu1 %vm5638_vm4, %v5636_v9 }
0x1636   :  { %v6318_v40 = vpop.f32.mrb[30].mxu0 }
0x1637   :  { %v5234_v0 = vpop.f32.mrb[31].mxu0 }
0x163a   :  { %v6320_v6 = vpop.f32.mrb[40].mxu1  ;;  %v3346_v13 = vpop.f32.mrb[32].mxu0 }
0x163b   :  { %v3347_v41 = vadd.f32 %v5964_v23, %v3346_v13  ;;  %v5239_v14 = vpop.f32.mrb[41].mxu1  ;;  %v5244_v42 = vpop.f32.mrb[33].mxu0 }
0x163d   :  { %v3428_v43 = vsel %vm516_vm6, %v3347_v41, -inf }
0x163e   :  { %3429 = vmax.xlane.f32.xlu0 %v3428_v43  ;;  %v3424_v44 = vpop.f32.mrb[42].mxu1 }
0x163f   :  { %v3425_v45 = vadd.f32 %v5964_v23, %v3424_v44  ;;  %v5249_v59 = vpop.f32.mrb[43].mxu1 }
0x1640   :  { %v4762_v59 = vld [vmem:[%s6550_s12 + $0x20] sm:$0xff] }
0x1641   :  { %v3431_v58 = vsel %vm516_vm6, %v3425_v45, -inf }
0x1642   :  { %3432 = vmax.xlane.f32.xlu1 %v3431_v58 }
0x1653   :  { %3450 = vrot.lane.b32.xlu1 %v6224_v36, %s5640_s4 }
0x1654   :  { %3526 = vrot.lane.b32.xlu0 %v6220_v15, %s5640_s4  ;;  %s5646_s4 = smov [#allocation2]  }
0x1657   :  { %3605 = vrot.lane.b32.xlu1 %v6230_v18, %s5641_s29 }
0x165b   :  { %3683 = vrot.lane.b32.xlu1 %v6228_v17, %s5641_s29 }
0x165f   :  { %3681 = vrot.lane.b32.xlu1 %v6218_v12, %s5641_s29 }
0x16cb   :  { %v3430_v23 = vpop.xlane.xlu0 %3429 }
0x16cc   :  { %v3434_v46 = vsub.f32 %v3347_v41, %v3430_v23 }
0x16ce   :  { %v3436_v48 = vmul.f32 1.442695, %v3434_v46 }
0x16cf   :  { %v3527_v49 = vpop.permute.xlu0 %3526  ;;  %v3433_v50 = vpop.xlane.xlu1 %3432 }
0x16d0   :  { %5577 = vpow2.f32 %v3436_v48  ;;  %v3435_v51 = vsub.f32 %v3425_v45, %v3433_v50  ;;  %5256 = vmatpush3.msra.mxu1 %v3527_v49  ;;  %v4764_v48 = vld [vmem:[%s6550_s12 + $0x30] sm:$0xff]  ;;  %v4765_v49 = vld [vmem:[%s6550_s12 + $0x38] sm:$0xff] }
0x16d1   :  { %5265 = vmatprep.subr.mxu1 %v5636_v9  ;;  %v5461_v50 = vpack.c.bf16 %v4765_v49, %v4764_v48  ;;  %v4783_v48 = vld [vmem:[%s6554_s16 + $0x58] sm:$0xff] }
0x16d2   :  { %v3438_v52 = vmul.f32 1.442695, %v3435_v51  ;;  %v4756_v51 = vld [vmem:[%s6549_s11 + $0x20] sm:$0xff] }
0x16d3   :  { %v3451_v53 = vpop.permute.xlu1 %3450 }
0x16d4   :  { %5579 = vpow2.f32 %v3438_v52  ;;  %5251 = vmatpush3.msra.mxu0 %v3451_v53  ;;  %v4757_v52 = vld [vmem:[%s6549_s11 + $0x28] sm:$0xff] }
0x16d5   :  { %5260 = vmatprep.subr.mxu0 %v5636_v9  ;;  %v5449_v53 = vpack.c.bf16 %v4757_v52, %v4756_v51  ;;  %v4785_v51 = vld [vmem:[%s6554_s16 + $0x68] sm:$0xff] }
0x16d7   :  { %v3606_v57 = vpop.permute.xlu1 %3605 }
0x16da   :  { %v5578_v17 = vpop.eup %5577 }
0x16db   :  { %v3440_v18 = vsel %vm516_vm6, %v5578_v17, 0.0  ;;  %v3684_v5 = vpop.permute.xlu1 %3683 }
0x16dc   :  { %3441 = vadd.xlane.f32.xlu0 %v3440_v18  ;;  %v4759_v18 = vld [vmem:[%s6549_s11 + $0x38] sm:$0xff] }
0x16de   :  { %v5580_v12 = vpop.eup %5579 }
0x16df   :  { %v3443_v54 = vsel %vm516_vm6, %v5580_v12, 0.0  ;;  %v3682_v10 = vpop.permute.xlu1 %3681 }
0x16e0   :  { %3444 = vadd.xlane.f32.xlu0 %v3443_v54 }
0x16f6   :  { %3603 = vrot.lane.b32.xlu0 %v6222_v16, %s5641_s29 }
0x1769   :  { %v3442_v60 = vpop.xlane.xlu0 %3441 }
0x176a   :  { %5581 = vrcp.f32 %v3442_v60 }
0x176d   :  { %v3445_v55 = vpop.xlane.xlu0 %3444 }
0x176e   :  { %5583 = vrcp.f32 %v3445_v55 }
0x1771   :  { %v3604_v16 = vpop.permute.xlu0 %3603 }
0x1774   :  { %v5582_v38 = vpop.eup %5581 }
0x1775   :  { %v3448_v1 = vmul.f32 %v5582_v38, %v5578_v17  ;;  %v4758_v17 = vld [vmem:[%s6549_s11 + $0x30] sm:$0xff] }
0x1777   :  { %5253 = vmatmul.mubr.msk.f32.vlgmr.msra.gmra.mrb[34].mxu0 %vm516_vm6, %v3448_v1 }
0x1778   :  { %v5584_v3 = vpop.eup %5583  ;;  %5261 = vmatpush3.xpose.msk.msra.mxu0 %vm516_vm6, %v3606_v57  ;;  %5262 = vmatprep.mubr.msk.f32.mxu0 %vm5638_vm4, %v5636_v9 }
0x1779   :  { %v3449_v8 = vmul.f32 %v5584_v3, %v5580_v12  ;;  %5270 = vmatprep.subr.mxu0 %v5636_v9 }
0x177b   :  { %5258 = vmatmul.mubr.msk.f32.vlgmr.msra.gmra.mrb[44].mxu1 %vm516_vm6, %v3449_v8  ;;  %5263 = vmatmul.mubr.msk.f32.vlgmr.msra.gmra.mrb[36].mxu0 %vm516_vm6, %v3604_v16 }
0x177c   :  { %5266 = vmatpush3.xpose.msk.msra.mxu1 %vm516_vm6, %v3684_v5  ;;  %5267 = vmatprep.mubr.msk.f32.mxu1 %vm5638_vm4, %v5636_v9 }
0x177d   :  { %5275 = vmatprep.subr.mxu1 %v5636_v9  ;;  %5272 = vmatprep.mubr.msk.f32.mxu0 %vm5638_vm4, %v5636_v9 }
0x177f   :  { %5268 = vmatmul.mubr.msk.f32.vlgmr.msra.gmra.mrb[46].mxu1 %vm516_vm6, %v3682_v10 }
0x1780   :  { %5277 = vmatprep.mubr.msk.f32.mxu1 %vm5638_vm4, %v5636_v9 }
0x184a   :  { %v3522_v11 = vpop.f32.mrb[34].mxu0 }
0x184b   :  { %v5254_v19 = vpop.f32.mrb[35].mxu0 }
0x184c   :  { %v4767_v19 = vld [vmem:[%s6551_s13 + $0x20] sm:$0xff] }
0x184e   :  { %v3598_v20 = vpop.f32.mrb[44].mxu1  ;;  %v3677_v22 = vpop.f32.mrb[36].mxu0 }
0x184f   :  { %v3678_v26 = vadd.f32 %v6007_v2, %v3677_v22  ;;  %v5259_v39 = vpop.f32.mrb[45].mxu1  ;;  %v5264_v27 = vpop.f32.mrb[37].mxu0 }
0x1851   :  { %v3759_v28 = vsel %vm516_vm6, %v3678_v26, -inf }
0x1852   :  { %3760 = vmax.xlane.f32.xlu0 %v3759_v28  ;;  %v3755_v29 = vpop.f32.mrb[46].mxu1  ;;  %v4769_v28 = vld [vmem:[%s6551_s13 + $0x30] sm:$0xff] }
0x1853   :  { %v3756_v63 = vadd.f32 %v6007_v2, %v3755_v29  ;;  %v5269_v30 = vpop.f32.mrb[47].mxu1  ;;  %v4770_v29 = vld [vmem:[%s6551_s13 + $0x38] sm:$0xff] }
0x1854   :  { %v5467_v30 = vpack.c.bf16 %v4770_v29, %v4769_v28 }
0x1855   :  { %v3762_v32 = vsel %vm516_vm6, %v3756_v63, -inf }
0x1856   :  { %3763 = vmax.xlane.f32.xlu1 %v3762_v32 }
0x1867   :  { %3781 = vrot.lane.b32.xlu1 %v6224_v36, %s5641_s29 }
0x186b   :  { %3935 = vrot.lane.b32.xlu1 %v6318_v40, %s5642_s6 }
0x186f   :  { %3937 = vrot.lane.b32.xlu1 %v6320_v6, %s5642_s6 }
0x1873   :  { %3945 = vrot.lane.b32.xlu1 %v3598_v20, %s5643_s19  ;;  %v4768_v20 = vld [vmem:[%s6551_s13 + $0x28] sm:$0xff]  ;;  %s6564_s13 = sld [smem:[#allocation6_spill]] }
0x18df   :  { %v3761_v33 = vpop.xlane.xlu0 %3760 }
0x18e0   :  { %v3765_v35 = vsub.f32 %v3678_v26, %v3761_v33 }
0x18e2   :  { %v3767_v37 = vmul.f32 1.442695, %v3765_v35 }
0x18e3   :  { %v3764_v62 = vpop.xlane.xlu1 %3763 }
0x18e4   :  { %5585 = vpow2.f32 %v3767_v37  ;;  %v3766_v2 = vsub.f32 %v3756_v63, %v3764_v62 }
0x18e6   :  { %v3769_v0 = vmul.f32 1.442695, %v3766_v2 }
0x18e7   :  { %v3782_v13 = vpop.permute.xlu1 %3781 }
0x18e8   :  { %5587 = vpow2.f32 %v3769_v0  ;;  %5271 = vmatpush3.msra.mxu0 %v3782_v13 }
0x18e9   :  { %5450 = vmatprep.subr.bf16.mxu0 %v5449_v53 }
0x18eb   :  { %v3936_v1 = vpop.permute.xlu1 %3935 }
0x18ec   :  { %v3957_v8 = vsel %vm516_vm6, %v6278_v47, %v3936_v1  ;;  %v5464_v47 = vpack.c.bf16 %v4768_v20, %v4767_v19 }
0x18ee   :  { %v5586_v41 = vpop.eup %5585 }
0x18ef   :  { %v3771_v36 = vsel %vm516_vm6, %v5586_v41, 0.0  ;;  %v3938_v3 = vpop.permute.xlu1 %3937 }
0x18f0   :  { %3772 = vadd.xlane.f32.xlu0 %v3771_v36  ;;  %v3958_v26 = vsel %vm516_vm6, %v6280_v56, %v3938_v3 }
0x18f2   :  { %v5588_v40 = vpop.eup %5587 }
0x18f3   :  { %v3774_v14 = vsel %vm516_vm6, %v5588_v40, 0.0  ;;  %v3946_v16 = vpop.permute.xlu1 %3945 }
0x18f4   :  { %3775 = vadd.xlane.f32.xlu0 %v3774_v14  ;;  %v3960_v39 = vsel %vm78_vm0, %v3958_v26, %v3946_v16  ;;  %v4787_v16 = vld [vmem:[%s6554_s16 + $0x78] sm:$0xff] }
0x190a   :  { %3857 = vrot.lane.b32.xlu0 %v6220_v15, %s5641_s29  ;;  %v4763_v15 = vld [vmem:[%s6550_s12 + $0x28] sm:$0xff]  ;;  %s4652_s29 = sshll.u32 %s5646_s4, 4  ;;  %s4653_s29 = int_to_ptr.vmem [resolvable:$true] %s4652_s29 }
0x190b   :  { %v5458_v23 = vpack.c.bf16 %v4763_v15, %v4762_v59  ;;  %v4780_v15 = vld [vmem:[%s6554_s16 + $0x40] sm:$0xff]  ;;  %s5611_s6 = scalar_lea.vmem %s4653_s29, 16  ;;  %p5616_p1 = scmp.lt.s32.totalorder %s4653_s29, %s4653_s29 }
0x190c   :  { %p5612_p0 = scmp.ne.s32.totalorder %s4653_s29, %s5611_s6 }
0x190e   :  { %3943 = vrot.lane.b32.xlu0 %v3522_v11, %s5643_s19  ;;  %s5615_s19 = scalar_lea.vmem %s4653_s29, 32 }
0x190f   :  { %p5617_p2 = scmp.lt.s32.totalorder %s5615_s19, %s5611_s6 }
0x1911   :  { %p5618_p3 = por %p5617_p2, %p5616_p1 }
0x1913   :  { %p5619_p4 = pnand %p5618_p3, %p5612_p0 }
0x197d   :  { %v3773_v6 = vpop.xlane.xlu0 %3772 }
0x197e   :  { %5589 = vrcp.f32 %v3773_v6 }
0x1981   :  { %v3776_v42 = vpop.xlane.xlu0 %3775 }
0x1982   :  { %5591 = vrcp.f32 %v3776_v42 }
0x1985   :  { %v3858_v43 = vpop.permute.xlu0 %3857 }
0x1986   :  { %5276 = vmatpush3.msra.mxu1 %v3858_v43 }
0x1987   :  { %5457 = vmatprep.subr.bf16.mxu1 %v5637_v24 }
0x1988   :  { %v5590_v44 = vpop.eup %5589 }
0x1989   :  { %v3779_v45 = vmul.f32 %v5590_v44, %v5586_v41  ;;  %v3944_v5 = vpop.permute.xlu0 %3943 }
0x198a   :  { %v3959_v10 = vsel %vm78_vm0, %v3957_v8, %v3944_v5  ;;  %v4786_v8 = vld [vmem:[%s6554_s16 + $0x70] sm:$0xff] }
0x198b   :  { %5273 = vmatmul.mubr.msk.f32.vlgmr.msra.gmra.mrb[38].mxu0 %vm516_vm6, %v3779_v45  ;;  %v4777_v45 = vld [vmem:[%s6553_s15 + $0x38] sm:$0xff] }
0x198c   :  { %v5592_v58 = vpop.eup %5591  ;;  %5452 = vmatpush3.bf16.msra.mxu0 %v5449_v53 }
0x198d   :  { %v3780_v46 = vmul.f32 %v5592_v58, %v5588_v40  ;;  %v4781_v58 = vld [vmem:[%s6554_s16 + $0x48] sm:$0xff] }
0x198f   :  { %5278 = vmatmul.mubr.msk.f32.vlgmr.msra.gmra.mrb[48].mxu1 %vm516_vm6, %v3780_v46  ;;  %v5477_v46 = vpack.c.bf16 %v4781_v58, %v4780_v15 }
0x1990   :  { %5459 = vmatpush3.bf16.msra.mxu1 %v5458_v23  ;;  %5299 = vmatprep.mubr.msk.f32.mxu1 %vm5638_vm4, %v5636_v9  ;;  %v4782_v23 = vld [vmem:[%s6554_s16 + $0x50] sm:$0xff] }
0x1991   :  { %5460 = vmatprep.subr.bf16.mxu1 %v5637_v24  ;;  %v5481_v49 = vpack.c.bf16 %v4783_v48, %v4782_v23 }
0x1994   :  { %5462 = vmatpush3.bf16.msra.mxu1 %v5461_v50  ;;  %v4784_v50 = vld [vmem:[%s6554_s16 + $0x60] sm:$0xff] }
0x1995   :  { %v5485_v52 = vpack.c.bf16 %v4785_v51, %v4784_v50 }
0x1997   :  { %5300 = vmatmul.mubr.msk.f32.vlgmr.msra.gmra.mrb[50].mxu1 %vm248_vm3, %v6047_v61  ;;  %v5453_v61 = vpack.c.bf16 %v4759_v18, %v4758_v17 }
0x1999   :  { %5454 = vmatprep.subr.bf16.mxu0 %v5453_v61 }
0x199a   :  { %5456 = vmatpush3.bf16.msra.mxu0 %v5453_v61 }
0x199b   :  { %5463 = vmatprep.subr.bf16.mxu0 %v5637_v24 }
0x1a5e   :  { %v3853_v12 = vpop.f32.mrb[38].mxu0 }
0x1a5f   :  { %3951 = vrot.lane.b32.xlu0 %v3853_v12, %s5644_s22  ;;  %v5274_v54 = vpop.f32.mrb[39].mxu0 }
0x1a62   :  { %v3929_v60 = vpop.f32.mrb[48].mxu1 }
0x1a63   :  { %3953 = vrot.lane.b32.xlu1 %v3929_v60, %s5644_s22  ;;  %v5279_v55 = vpop.f32.mrb[49].mxu1 }
0x1a64   :  { %v4773_v55 = vld [vmem:[%s6552_s14 + $0x1] ss:$0 sm:$0xff] }
0x1a6a   :  { %v4122_v57 = vpop.f32.mrb[50].mxu1 }
0x1a6b   :  { %v5301_v38 = vpop.f32.mrb[51].mxu1 }
0x1ad1   :  { %v3952_v11 = vpop.permute.xlu0 %3951 }
0x1ad2   :  { %v3961_v22 = vsel %vm171_vm5, %v3959_v10, %v3952_v11  ;;  %v5489_v10 = vpack.c.bf16 %v4787_v16, %v4786_v8 }
0x1ad3   :  { %5288 = vmatprep.mubr.msk.f32.mxu0 %vm248_vm3, %v3961_v22 }
0x1ad5   :  { %v3954_v27 = vpop.permute.xlu1 %3953 }
0x1ad6   :  { %v3962_v63 = vsel %vm171_vm5, %v3960_v39, %v3954_v27 }
0x1ad7   :  { %5289 = vmatmul.mubr.msk.f32.vlgmr.msra.gmra.mrb[40].mxu0 %vm248_vm3, %v3962_v63 }
0x1ad8   :  { %5465 = vmatpush3.bf16.msra.mxu0 %v5464_v47  ;;  %5310 = vmatprep.mubr.msk.f32.mxu0 %vm5638_vm4, %v5636_v9 }
0x1ad9   :  { %5466 = vmatprep.subr.bf16.mxu0 %v5637_v24 }
0x1adc   :  { %5468 = vmatpush3.bf16.msra.mxu0 %v5467_v30 }
0x1add   :  { %5478 = vmatprep.subr.bf16.mxu0 %v5477_v46 }
0x1adf   :  { %5311 = vmatmul.mubr.msk.f32.vlgmr.msra.gmra.mrb[42].mxu0 %vm248_vm3, %v4122_v57 }
0x1ae0   :  { %5480 = vmatpush3.bf16.msra.mxu0 %v5477_v46 }
0x1ae1   :  { %5482 = vmatprep.subr.bf16.mxu0 %v5481_v49 }
0x1ae4   :  { %5484 = vmatpush3.bf16.msra.mxu0 %v5481_v49 }
0x1ae5   :  { %5486 = vmatprep.subr.bf16.mxu0 %v5485_v52 }
0x1ae8   :  { %5488 = vmatpush3.bf16.msra.mxu0 %v5485_v52 }
0x1ae9   :  { %5490 = vmatprep.subr.bf16.mxu0 %v5489_v10 }
0x1aec   :  { %5492 = vmatpush3.bf16.msra.mxu0 %v5489_v10 }
0x1baa   :  { %v5290_v56 = vpop.f32.mrb[40].mxu0 }
0x1bab   :  { %v4040_v32 = vpop.f32.mrb[41].mxu0  ;;  %v4050_v24 = vadd.f32 %v5290_v56, %v6154_v21  ;;  %v4776_v21 = vld [vmem:[%s6553_s15 + $0x30] sm:$0xff] }
0x1bac   :  { %v4049_v0 = vadd.f32 %v4040_v32, %v6157_v25  ;;  %v5473_v59 = vpack.c.bf16 %v4777_v45, %v4776_v21 }
0x1bb2   :  { %v4200_v33 = vpop.f32.mrb[42].mxu0 }
0x1bb3   :  { %v4211_v35 = vrot.slane %v4200_v33, %v6095_v31  ;;  %v5312_v37 = vpop.f32.mrb[43].mxu0 }
0x1bb5   :  { %v4212_v62 = vcombine.high %v4211_v35, %v4211_v35  ;;  %v4219_v2 = vrot.slane %v4211_v35, %v6095_v31 }
0x1bb7   :  { %v4226_v13 = vrot.slane %v4212_v62, %v6095_v31  ;;  %v4230_v41 = vrot.slane %v4219_v2, %v6098_v34  ;;  %v4774_v31 = vld [vmem:[%s6553_s15 + $0x20] sm:$0xff] }
0x1bb9   :  { %v4234_v36 = vrot.slane %v4226_v13, %v6098_v34  ;;  %v6442_v40 = vadd.f32 %v4230_v41, %v4049_v0  ;;  %v4775_v34 = vld [vmem:[%s6553_s15 + $0x28] sm:$0xff]  ;;  %v4790_v0 = vld [vmem:[%s6555_s17] ss:$0 sm:$0xff] }
0x1bba   :  { %v5469_v44 = vpack.c.bf16 %v4775_v34, %v4774_v31  ;;  %v4559_v31 = vld [vmem:[%s6564_s13] sm:$0xff]  ;;  %v4560_v34 = vld [vmem:[%s6564_s13 + $0x8] sm:$0xff] }
0x1bbb   :  { %v4241_v14 = vmul.f32 %v6442_v40, %v6442_v40  ;;  %v4238_v6 = vadd.f32 %v4234_v36, %v4050_v24  ;;  %vm4606_vm11 = vcmp.ne.s32.totalorder %v4560_v34, 4294967196  ;;  %vm4605_vm12 = vcmp.ne.s32.totalorder %v4559_v31, 4294967196 }
0x1bbc   :  { %5470 = vmatprep.subr.bf16.mxu1 %v5469_v44 }
0x1bbd   :  { %v4243_v42 = vsel %vm248_vm3, %v4241_v14, 0.0  ;;  %v4242_v43 = vmul.f32 %v4238_v6, %v4238_v6  ;;  %5472 = vmatpush3.bf16.msra.mxu1 %v5469_v44 }
0x1bbe   :  { %4244 = vadd.xlane.f32.xlu0 %v4243_v42  ;;  %5474 = vmatprep.subr.bf16.mxu1 %v5473_v59 }
0x1bbf   :  { %v4246_v25 = vsel %vm248_vm3, %v4242_v43, 0.0 }
0x1bc0   :  { %4247 = vadd.xlane.f32.xlu1 %v4246_v25 }
0x1bc1   :  { %5476 = vmatpush3.bf16.msra.mxu1 %v5473_v59 }
0x1bc2   :  { %5495 = vmatprep.subr.msk.bf16.mxu1 %vm5494_vm8, %v5751_v4 }
0x1c4b   :  { %v4245_v53 = vpop.xlane.xlu0 %4244 }
0x1c4c   :  { %v4249_v17 = vmul.f32 0.03125, %v4245_v53 }
0x1c4d   :  { %v4248_v18 = vpop.xlane.xlu1 %4247 }
0x1c4e   :  { %v4251_v61 = vadd.f32 1e-06, %v4249_v17  ;;  %v4250_v12 = vmul.f32 0.03125, %v4248_v18 }
0x1c50   :  { %5593 = vrsqrt.f32 %v4251_v61  ;;  %v4252_v54 = vadd.f32 1e-06, %v4250_v12 }
0x1c52   :  { %5595 = vrsqrt.f32 %v4252_v54  ;;  %v4797_v54 = vsel %vm4605_vm12, 1.0, %v5636_v9 }
0x1c5a   :  { %v5594_v60 = vpop.eup %5593 }
0x1c5b   :  { %v4255_v57 = vmul.f32 %v5594_v60, %v6442_v40  ;;  %v4629_v60 = vsel %vm4615_vm13, %v4797_v54, 0.0 }
0x1c5c   :  { %v5596_v38 = vpop.eup %5595 }
0x1c5d   :  { %v4256_v1 = vmul.f32 %v5596_v38, %v4238_v6  ;;  %v4263_v3 = vmul.f32 %v4773_v55, %v4255_v57 }
0x1c5f   :  { %v4264_v5 = vmul.f32 %v4773_v55, %v4256_v1  ;;  %5321 = vmatprep.mubr.msk.f32.mxu1 %vm248_vm3, %v4263_v3 }
0x1c61   :  { %5322 = vmatmul.mubr.msk.f32.vlgmr.msra.gmra.mrb[52].mxu1 %vm248_vm3, %v4264_v5 }
0x1c62   :  { %5498 = vmatpush3.bf16.xpose.msk.msra.mxu1 %vm5494_vm8, %v5751_v4 }
0x1d34   :  { %v5323_v11 = vpop.f32.mrb[52].mxu1 }
0x1d35   :  { %v4342_v19 = vpop.f32.mrb[53].mxu1  ;;  %v4352_v22 = vmax.f32 %v5323_v11, 0.0 }
0x1d36   :  { %v4351_v20 = vmax.f32 %v4342_v19, 0.0 }
0x1d38   :  { %5340 = vmatprep.mubr.msk.f32.mxu0 %vm2261_vm7, %v4351_v20 }
0x1d39   :  { %5341 = vmatmul.mubr.msk.f32.vlgmr.msra.gmra.mrb[44].mxu0 %vm2261_vm7, %v4352_v22 }
0x1e0c   :  { %v5342_v26 = vpop.f32.mrb[44].mxu0 }
0x1e0d   :  { %v4434_v47 = vpop.f32.mrb[45].mxu0  ;;  %v4444_v39 = vadd.f32 %v5342_v26, %v4238_v6 }
0x1e0e   :  { %v4443_v27 = vadd.f32 %v4434_v47, %v6442_v40 }
0x1e0f   :  { %v4447_v63 = vmul.f32 %v4444_v39, %v4444_v39 }
0x1e10   :  { %v4446_v28 = vmul.f32 %v4443_v27, %v4443_v27 }
0x1e11   :  { %v4451_v30 = vsel %vm248_vm3, %v4447_v63, 0.0 }
0x1e12   :  { %v4448_v29 = vsel %vm248_vm3, %v4446_v28, 0.0 }
0x1e13   :  { %4449 = vadd.xlane.f32.xlu0 %v4448_v29 }
0x1e17   :  { %4452 = vadd.xlane.f32.xlu0 %v4451_v30 }
0x1ea0   :  { %v4450_v56 = vpop.xlane.xlu0 %4449 }
0x1ea1   :  { %v4454_v32 = vmul.f32 0.03125, %v4450_v56 }
0x1ea3   :  { %v4456_v33 = vadd.f32 1e-06, %v4454_v32 }
0x1ea4   :  { %v4453_v35 = vpop.xlane.xlu0 %4452 }
0x1ea5   :  { %5597 = vrsqrt.f32 %v4456_v33  ;;  %v4455_v37 = vmul.f32 0.03125, %v4453_v35 }
0x1ea7   :  { %v4457_v62 = vadd.f32 1e-06, %v4455_v37 }
0x1ea9   :  { %5599 = vrsqrt.f32 %v4457_v62 }
0x1eaf   :  { %v5598_v2 = vpop.eup %5597 }
0x1eb0   :  { %v4460_v13 = vmul.f32 %v5598_v2, %v4443_v27 }
0x1eb2   :  { %v4468_v41 = vmul.f32 %v4790_v0, %v4460_v13 }
0x1eb3   :  { %v5600_v24 = vpop.eup %5599 }
0x1eb4   :  { %v4461_v36 = vmul.f32 %v5600_v24, %v4444_v39  ;;  %v4470_v40 = vmul.f32 0.17677669, %v4468_v41 }
0x1eb6   :  { %v4469_v14 = vmul.f32 %v4790_v0, %v4461_v36  ;;  %5347 = vmatprep.mubr.msk.f32.mxu1 %vm248_vm3, %v4470_v40 }
0x1eb8   :  { %v4471_v4 = vmul.f32 0.17677669, %v4469_v14 }
0x1eba   :  { %5348 = vmatmul.mubr.msk.f32.vlgmr.msra.gmra.mrb[54].mxu1 %vm248_vm3, %v4471_v4 }
0x1f8d   :  { %v5349_v6 = vpop.f32.mrb[54].mxu1 }
0x1f8e   :  { %v4550_v42 = vpop.f32.mrb[55].mxu1  ;;  %v4564_v43 = vsel %vm78_vm0, %v5349_v6, -inf }
0x1f8f   :  { %4565 = vmax.xlane.f32.xlu0 %v4564_v43  ;;  %v4561_v25 = vsel %vm78_vm0, %v4550_v42, -inf }
0x1f90   :  { %4562 = vmax.xlane.f32.xlu1 %v4561_v25 }
0x1fa1   :  { %4586 = vperm.xlu1 %5516, %v4559_v31  }
0x1fa5   :  { %4589 = vperm.xlu0 %5515, %v4560_v34  }
0x201c   :  { %v4566_v21 = vpop.xlane.xlu0 %4565 }
0x201d   :  { %v4568_v44 = vsub.f32 %v5349_v6, %v4566_v21  ;;  %v4563_v45 = vpop.xlane.xlu1 %4562 }
0x201e   :  { %v4567_v59 = vsub.f32 %v4550_v42, %v4563_v45 }
0x201f   :  { %v4571_v15 = vmul.f32 1.442695, %v4568_v44 }
0x2020   :  { %v4569_v58 = vmul.f32 1.442695, %v4567_v59 }
0x2021   :  { %5601 = vpow2.f32 %v4571_v15  ;;  %v4587_v23 = vpop.permute.xlu1 %4586 }
0x2022   :  { %5603 = vpow2.f32 %v4569_v58  ;;  %vm4591_vm10 = vcmp.eq.s32.totalorder %v5759_v7, %v4587_v23 }
0x2023   :  { %v4795_v49 = vsel %vm4591_vm10, 1.0, %v5636_v9 }
0x2024   :  { %v4590_v46 = vpop.permute.xlu0 %4589  ;;  %v4597_v17 = vmul.f32 %v4795_v49, %v4550_v42 }
0x2025   :  { %vm4592_vm9 = vcmp.eq.s32.totalorder %v5759_v7, %v4590_v46  ;;  %v4798_v7 = vsel %vm4606_vm11, 1.0, %v5636_v9 }
0x2026   :  { %v4796_v48 = vsel %vm4592_vm9, 1.0, %v5636_v9  ;;  %v4599_v12 = vsel %vm78_vm0, %v4597_v17, 0.0  ;;  %v4630_v55 = vsel %vm4615_vm13, %v4798_v7, 0.0 }
0x2027   :  { %v4598_v53 = vmul.f32 %v5349_v6, %v4796_v48  ;;  %v4631_v57 = vadd.f32 %v4630_v55, %v4629_v60 }
0x2029   :  { %v4602_v61 = vsel %vm78_vm0, %v4598_v53, 0.0 }
0x202b   :  { %v5602_v50 = vpop.eup %5601 }
0x202c   :  { %v5604_v51 = vpop.eup %5603  ;;  %v4576_v52 = vsel %vm78_vm0, %v5602_v50, 0.0 }
0x202d   :  { %4577 = vadd.xlane.f32.xlu0 %v4576_v52  ;;  %v4573_v18 = vsel %vm78_vm0, %v5604_v51, 0.0 }
0x202e   :  { %4574 = vadd.xlane.f32.xlu1 %v4573_v18 }
0x2031   :  { %4603 = vadd.xlane.f32.xlu0 %v4602_v61 }
0x2032   :  { %4600 = vadd.xlane.f32.xlu1 %v4599_v12 }
0x2035   :  { %4632 = vadd.xlane.f32.xlu0 %v4631_v57 }
0x20ba   :  { %v4578_v38 = vpop.xlane.xlu0 %4577 }
0x20bb   :  { %5605 = vlog2.f32 %v4578_v38  ;;  %v4575_v1 = vpop.xlane.xlu1 %4574 }
0x20bc   :  { %5607 = vlog2.f32 %v4575_v1 }
0x20be   :  { %v4604_v11 = vpop.xlane.xlu0 %4603 }
0x20bf   :  { %v4601_v22 = vpop.xlane.xlu1 %4600 }
0x20c2   :  { %v4633_v29 = vpop.xlane.xlu0 %4632 }
0x20c3   :  { %v4634_v63 = vrot.slane %v4633_v29, 4 }
0x20c5   :  { %v5606_v3 = vpop.eup %5605  ;;  %v4635_v30 = vadd.f32 %v4634_v63, %v4633_v29 }
0x20c6   :  { %v5608_v5 = vpop.eup %5607  ;;  %v4582_v8 = vmul.f32 0.6931472, %v5606_v3 }
0x20c7   :  { %v4580_v16 = vmul.f32 0.6931472, %v5608_v5  ;;  %v4636_v56 = vrot.slane %v4635_v30, 2 }
0x20c8   :  { %v4584_v10 = vadd.f32 %v4582_v8, %v4566_v21 }
0x20c9   :  { %v4583_v19 = vadd.f32 %v4580_v16, %v4563_v45  ;;  %v4637_v37 = vadd.f32 %v4636_v56, %v4635_v30 }
0x20ca   :  { %v4612_v20 = vsub.f32 %v4584_v10, %v4604_v11 }
0x20cb   :  { %v4611_v9 = vsub.f32 %v4583_v19, %v4601_v22  ;;  %v4638_v0 = vrot.slane %v4637_v37, 1 }
0x20cc   :  { %v4614_v26 = vmul.f32 %v4798_v7, %v4612_v20 }
0x20cd   :  { %v4613_v47 = vmul.f32 %v4797_v54, %v4611_v9  ;;  %v4639_v24 = vadd.f32 %v4638_v0, %v4637_v37 }
0x20ce   :  { %v4617_v39 = vsel %vm4615_vm13, %v4614_v26, 0.0 }
0x20cf   :  { %v4616_v27 = vsel %vm4615_vm13, %v4613_v47, 0.0 }
0x20d0   :  { %v4618_v28 = vadd.f32 %v4617_v39, %v4616_v27 }
0x20d2   :  { %4619 = vadd.xlane.f32.xlu1 %v4618_v28 }
0x215f   :  { %v4620_v32 = vpop.xlane.xlu1 %4619 }
0x2160   :  { %v4621_v33 = vrot.slane %v4620_v32, 4 }
0x2162   :  { %v4622_v35 = vadd.f32 %v4621_v33, %v4620_v32 }
0x2164   :  { %v4623_v62 = vrot.slane %v4622_v35, 2 }
0x2166   :  { %v4624_v2 = vadd.f32 %v4623_v62, %v4622_v35 }
0x2168   :  { %v4625_v13 = vrot.slane %v4624_v2, 1 }
0x216a   :  { %v4626_v41 = vadd.f32 %v4625_v13, %v4624_v2 }
0x216c   :  { %5499 = vpush %v4626_v41 }
0x216d   :  { %5501 = vpush %v4639_v24 }
0x219d   :  { %s5500_s9 = spop %5499 }
0x219e   :  { %s5502_s24 = spop %5501  ;;  %v4628_v14 = vstv %s5500_s9 }
0x219f   :  { %v4641_v36 = vstv %s5502_s24 }
0x21a0   :  { %5609 = vrcp.f32 %v4641_v36 }
0x21aa   :  { %v5610_v40 = vpop.eup %5609 }
0x21ab   :  { %v4643_v4 = vmul.f32 %v5610_v40, %v4628_v14 }
0x21ad   :  { %4645 = vst.msk [vmem:[#allocation2] sm:$0x1] %vm4644_vm14, %v4643_v4 }
0x21ae   :  { %5622 = shalt.err (!%p5619_p4)
}
0x21af   :  { %s5623_s1 = scalar_lea.hbm %s6556_s18, 16 }
0x21b0   :  { %p5624_p5 = scmp.ne.s32.totalorder %s6556_s18, %s5623_s1  ;;  %p5627_p6 = scmp.lt.u32.totalorder %s5623_s1, %s6556_s18 }
0x21b2   :  { %p5629_p7 = pnand %p5627_p6, %p5624_p5 }
0x21b4   :  { %5632 = shalt.err (!%p5629_p7)
}
0x21b5   :  { %4655 = dma.vmem_to_hbm [thread:$0]  %s4653_s29, 16, %s6556_s18, [#allocation3]  }
0x21b6   :  { %5633 = dma.done.wait [#allocation3], 16  }
0x21b7   :  { %5634 = vsyncadd [#allocation3], 4294967280 }
0x21b8   :  { %4659 = vsyncpa [#allocation3], 1 }

</bundles_post_ra>
